<compile_context>
chip_gen: v6e
topology: v6e:2x2x1
jax: 0.10.0
libtpu: 0.0.40
codegen_flags: <defaults>
</compile_context>

<pallas_src>
import jax
import jax.numpy as jnp
from jax.experimental import pallas as pl
from jax.experimental.pallas import tpu as pltpu

# ------------------------------- config -------------------------------------
BATCH   = 2
SEQ_LEN = 8
D_MODEL = 32
N_HEADS = 4
NEG_INF = -1.0e9   # matches torch masked_fill_(attn_mask, -1000000000.0)


# ----------------------------- Pallas kernel --------------------------------
def _mha_kernel(q_ref, k_ref, v_ref, mask_ref,
                wq_ref, bq_ref, wk_ref, bk_ref, wv_ref, bv_ref,
                wo_ref, bo_ref,
                out_ref, aw_ref):
    """Full multi-head attention for a block of BB batch elements.

    q/k/v_ref: (BB*S, D) rows.  mask_ref: (BB, H*S, H*S) additive mask that is
    -1e9 off the per-head diagonal blocks and encodes the user attn_mask on
    the blocks.  Outputs: out_ref (BB*S, D), aw_ref (BB, H*S, H*S).
    """
    BB, HS, _ = aw_ref.shape
    N, D = q_ref.shape            # N = BB * S
    S = N // BB
    H = HS // S
    dk = D // H
    scale = 1.0 / float(dk) ** 0.5
    bf16 = jnp.bfloat16

    # ---- input projections: one lane-dense (N, D) @ (D, D) matmul each ----
    def proj(x_ref, w_ref, b_ref):
        return jnp.dot(x_ref[...].astype(bf16), w_ref[...].astype(bf16),
                       preferred_element_type=jnp.float32) + b_ref[...]

    qp = proj(q_ref, wq_ref, bq_ref)          # (N, D) f32
    kp = proj(k_ref, wk_ref, bk_ref)
    vp = proj(v_ref, wv_ref, bv_ref)

    # ---- head split: lane groups (h*dk+f) -> sublane-stacked (BB, H*S, dk) --
    def head_stack(x):
        x3 = x.reshape(BB, S, D)              # free: split at 8-sublane boundary
        return jnp.concatenate(
            [x3[:, :, h * dk:(h + 1) * dk] for h in range(H)], axis=1)

    qh = head_stack(qp).astype(bf16)          # (BB, HS, dk)
    kh = head_stack(kp).astype(bf16)
    vh = head_stack(vp).astype(bf16)

    # ---- block-diagonal scores: one (HS, dk) @ (dk, HS) MXU pass / batch ----
    s = jnp.einsum('brf,bcf->brc', qh, kh,
                   preferred_element_type=jnp.float32) * scale
    s = s + mask_ref[...]                     # causal + off-head-block -1e9

    # ---- softmax over the full 32-lane row (off-block entries exp to 0) ----
    s = s - jnp.max(s, axis=-1, keepdims=True)
    e = jnp.exp(s)
    w = e * pl.reciprocal(jnp.sum(e, axis=-1, keepdims=True), approx=True)

    # single lane-dense store of the attention-weight slab
    aw_ref[...] = w

    # ---- context: one (HS, HS) @ (HS, dk) MXU pass per batch element -------
    ctx = jnp.einsum('brc,bcf->brf', w.astype(bf16), vh,
                     preferred_element_type=jnp.float32)       # (BB, HS, dk)

    # ---- re-pack heads into lanes, then one full output projection ---------
    ctx_lane = jnp.concatenate(
        [ctx[:, h * S:(h + 1) * S, :] for h in range(H)], axis=-1)  # (BB,S,D)
    out = jnp.dot(ctx_lane.reshape(N, D).astype(bf16),
                  wo_ref[...].astype(bf16),
                  preferred_element_type=jnp.float32) + bo_ref[...]
    out_ref[...] = out


# ------------------------------ wrapper --------------------------------------
def _tensorcores_per_chip():
    """2 TensorCores per Pallas device on v4 (megacore) and v7x, else 1."""
    try:
        kind = jax.devices()[0].device_kind.lower()
    except Exception:
        return 1
    if "v4" in kind or "v7" in kind or "7x" in kind:
        return 2
    return 1


def multi_head_attention(Q, K, V, attn_mask, params, n_heads=N_HEADS):
    """Q,K,V: (B,S,D) f32.  attn_mask: (B,S,S) bool (True = masked).

    Returns (outputs (B,S,D), attn_weights (B,H,S,S)) like the torch module.
    """
    B, S, D = Q.shape
    H = n_heads
    dk = D // H
    HS = H * S

    # Batch block per grid step: one element per core on 2-TC chips, otherwise
    # fold the whole batch into a single step (problem is overhead-bound).
    BB = 1 if (_tensorcores_per_chip() >= 2 and B > 1) else B
    n_steps = B // BB

    # Flatten the batch into the sublane dimension for the projections.
    q2 = Q.reshape(B * S, D)
    k2 = K.reshape(B * S, D)
    v2 = V.reshape(B * S, D)

    # Additive mask over the head-block-diagonal (HS, HS) score matrix:
    #   big_mask[b, h*S+i, h'*S+j] = -1e9 if (h != h') or attn_mask[b,i,j] else 0
    block_ok = jnp.kron(jnp.eye(H, dtype=jnp.float32),
                        jnp.ones((S, S), jnp.float32)) > 0.5          # (HS,HS)
    masked = jnp.tile(attn_mask, (1, H, H)) | jnp.logical_not(block_ok)[None]
    big_mask = jnp.where(masked, NEG_INF, 0.0).astype(jnp.float32)    # (B,HS,HS)

    weights = [params["wq"], params["bq"].reshape(1, D),
               params["wk"], params["bk"].reshape(1, D),
               params["wv"], params["bv"].reshape(1, D),
               params["wo"], params["bo"].reshape(1, D)]

    def full_spec(a):
        nd = a.ndim
        return pl.BlockSpec(a.shape, lambda g, _nd=nd: (0,) * _nd)

    in_specs = [
        pl.BlockSpec((BB * S, D), lambda g: (g, 0)),        # Q rows
        pl.BlockSpec((BB * S, D), lambda g: (g, 0)),        # K rows
        pl.BlockSpec((BB * S, D), lambda g: (g, 0)),        # V rows
        pl.BlockSpec((BB, HS, HS), lambda g: (g, 0, 0)),    # additive mask
    ] + [full_spec(a) for a in weights]

    out_specs = [pl.BlockSpec((BB * S, D), lambda g: (g, 0)),
                 pl.BlockSpec((BB, HS, HS), lambda g: (g, 0, 0))]
    out_shape = [jax.ShapeDtypeStruct((B * S, D), jnp.float32),
                 jax.ShapeDtypeStruct((B, HS, HS), jnp.float32)]

    out2, aw_full = pl.pallas_call(
        _mha_kernel,
        grid=(n_steps,),
        in_specs=in_specs,
        out_specs=out_specs,
        out_shape=out_shape,
        compiler_params=pltpu.CompilerParams(
            dimension_semantics=("parallel",)),
    )(q2, k2, v2, big_mask, *weights)

    outputs = out2.reshape(B, S, D)
    # Extract the per-head diagonal blocks -> (B, H, S, S).  Off-block entries
    # are exactly 0 after the -1e9 mask, so this is pure layout plumbing.
    attn_weights = jnp.stack(
        [aw_full[:, h * S:(h + 1) * S, h * S:(h + 1) * S] for h in range(H)],
        axis=1)
    return outputs, attn_weights


# --------------------------- synthetic parameters ----------------------------
def init_params(key, d_model=D_MODEL):
    ks = jax.random.split(key, 8)

    def w(k):
        return (0.02 * jax.random.normal(k, (d_model, d_model))).astype(jnp.float32)

    def b(k):
        return (0.02 * jax.random.normal(k, (d_model,))).astype(jnp.float32)

    # nn.Linear weights stored pre-transposed as (in, out) so y = x @ W + b.
    return {"wq": w(ks[0]), "bq": b(ks[1]),
            "wk": w(ks[2]), "bk": b(ks[3]),
            "wv": w(ks[4]), "bv": b(ks[5]),
            "wo": w(ks[6]), "bo": b(ks[7])}


# ---------------------------- pure-JAX reference -----------------------------
def mha_reference(Q, K, V, attn_mask, params, n_heads=N_HEADS):
    B, S, D = Q.shape
    dk = D // n_heads

    def proj(x, w, b):
        y = x @ w + b
        return y.reshape(B, S, n_heads, dk).transpose(0, 2, 1, 3)   # (B,H,S,dk)

    qh = proj(Q, params["wq"], params["bq"])
    kh = proj(K, params["wk"], params["bk"])
    vh = proj(V, params["wv"], params["bv"])
    s = jnp.einsum('bhqd,bhkd->bhqk', qh, kh) / (dk ** 0.5)
    s = jnp.where(attn_mask[:, None, :, :], NEG_INF, s)
    w = jax.nn.softmax(s, axis=-1)
    ctx = jnp.einsum('bhqk,bhkd->bhqd', w, vh)
    ctx = ctx.transpose(0, 2, 1, 3).reshape(B, S, D)
    out = ctx @ params["wo"] + params["bo"]
    return out, w


# ----------------------------------- main ------------------------------------
if __name__ == "__main__":
    key = jax.random.PRNGKey(0)
    kparams, kq, kk, kv = jax.random.split(key, 4)
    params = init_params(kparams)

    Q = jax.random.normal(kq, (BATCH, SEQ_LEN, D_MODEL), jnp.float32)
    K = jax.random.normal(kk, (BATCH, SEQ_LEN, D_MODEL), jnp.float32)
    V = jax.random.normal(kv, (BATCH, SEQ_LEN, D_MODEL), jnp.float32)

    # Boolean mask, True = masked (causal / "subsequent" mask).
    attn_mask = jnp.broadcast_to(
        jnp.triu(jnp.ones((SEQ_LEN, SEQ_LEN), dtype=jnp.bool_), k=1),
        (BATCH, SEQ_LEN, SEQ_LEN))

    mha = jax.jit(multi_head_attention)
    outputs, attn_w = mha(Q, K, V, attn_mask, params)
    outputs = jax.block_until_ready(outputs)
    attn_w = jax.block_until_ready(attn_w)

    assert outputs.shape == (BATCH, SEQ_LEN, D_MODEL)
    assert attn_w.shape == (BATCH, N_HEADS, SEQ_LEN, SEQ_LEN)
    assert bool(jnp.all(jnp.isfinite(outputs)))
    assert bool(jnp.all(jnp.isfinite(attn_w)))

    ref_out, ref_w = mha_reference(Q, K, V, attn_mask, params)
    assert jnp.allclose(outputs, ref_out, atol=1e-2, rtol=1e-2)
    assert jnp.allclose(attn_w, ref_w, atol=1e-2, rtol=1e-2)

    print("KERNEL_OK")
</pallas_src>

<mosaic_0001>
module attributes {stable_mosaic.version = 11 : i64} {
  func.func @_mha_kernel(%arg0: i32, %arg1: memref<16x32xf32, #tpu.memory_space<vmem>>, %arg2: memref<16x32xf32, #tpu.memory_space<vmem>>, %arg3: memref<16x32xf32, #tpu.memory_space<vmem>>, %arg4: memref<2x32x32xf32, #tpu.memory_space<vmem>>, %arg5: memref<32x32xf32, #tpu.memory_space<vmem>>, %arg6: memref<1x32xf32, #tpu.memory_space<vmem>>, %arg7: memref<32x32xf32, #tpu.memory_space<vmem>>, %arg8: memref<1x32xf32, #tpu.memory_space<vmem>>, %arg9: memref<32x32xf32, #tpu.memory_space<vmem>>, %arg10: memref<1x32xf32, #tpu.memory_space<vmem>>, %arg11: memref<32x32xf32, #tpu.memory_space<vmem>>, %arg12: memref<1x32xf32, #tpu.memory_space<vmem>>, %arg13: memref<16x32xf32, #tpu.memory_space<vmem>>, %arg14: memref<2x32x32xf32, #tpu.memory_space<vmem>>) attributes {dimension_semantics = [#tpu.dimension_semantics<parallel>], iteration_bounds = array<i64: 1>, scalar_prefetch = 0 : i64, scratch_operands = 0 : i64, tpu.core_type = #tpu.core_type<tc>, window_params = [{transform_indices = @transform_0, window_bounds = array<i64: 16, 32>}, {transform_indices = @transform_1, window_bounds = array<i64: 16, 32>}, {transform_indices = @transform_2, window_bounds = array<i64: 16, 32>}, {transform_indices = @transform_3, window_bounds = array<i64: 2, 32, 32>}, {pipeline_mode = #tpu.pipeline_mode<synchronous>, transform_indices = @transform_4, window_bounds = array<i64: 32, 32>}, {pipeline_mode = #tpu.pipeline_mode<synchronous>, transform_indices = @transform_5, window_bounds = array<i64: 1, 32>}, {pipeline_mode = #tpu.pipeline_mode<synchronous>, transform_indices = @transform_6, window_bounds = array<i64: 32, 32>}, {pipeline_mode = #tpu.pipeline_mode<synchronous>, transform_indices = @transform_7, window_bounds = array<i64: 1, 32>}, {pipeline_mode = #tpu.pipeline_mode<synchronous>, transform_indices = @transform_8, window_bounds = array<i64: 32, 32>}, {pipeline_mode = #tpu.pipeline_mode<synchronous>, transform_indices = @transform_9, window_bounds = array<i64: 1, 32>}, {pipeline_mode = #tpu.pipeline_mode<synchronous>, transform_indices = @transform_10, window_bounds = array<i64: 32, 32>}, {pipeline_mode = #tpu.pipeline_mode<synchronous>, transform_indices = @transform_11, window_bounds = array<i64: 1, 32>}, {transform_indices = @transform_12, window_bounds = array<i64: 16, 32>}, {transform_indices = @transform_13, window_bounds = array<i64: 2, 32, 32>}]} {
    %c0 = arith.constant 0 : index
    %c0_0 = arith.constant 0 : index
    %0 = vector.load %arg1[%c0, %c0_0] : memref<16x32xf32, #tpu.memory_space<vmem>>, vector<16x32xf32>
    %1 = arith.truncf %0 : vector<16x32xf32> to vector<16x32xbf16>
    %c0_1 = arith.constant 0 : index
    %c0_2 = arith.constant 0 : index
    %2 = vector.load %arg5[%c0_1, %c0_2] : memref<32x32xf32, #tpu.memory_space<vmem>>, vector<32x32xf32>
    %3 = arith.truncf %2 : vector<32x32xf32> to vector<32x32xbf16>
    %cst = arith.constant dense<0.000000e+00> : vector<16x32xf32>
    %4 = tpu.matmul %1, %3, %cst {dimension_numbers = #tpu.dot_dimension_numbers<[1], [0], [0], [1], [0, 0, 1, 1], [], []>} : vector<16x32xbf16>, vector<32x32xbf16>, vector<16x32xf32> -> vector<16x32xf32>
    %c0_3 = arith.constant 0 : index
    %c0_4 = arith.constant 0 : index
    %5 = vector.load %arg6[%c0_3, %c0_4] : memref<1x32xf32, #tpu.memory_space<vmem>>, vector<1x32xf32>
    %6 = vector.broadcast %5 : vector<1x32xf32> to vector<16x32xf32>
    %7 = arith.addf %4, %6 : vector<16x32xf32>
    %c0_5 = arith.constant 0 : index
    %c0_6 = arith.constant 0 : index
    %8 = vector.load %arg2[%c0_5, %c0_6] : memref<16x32xf32, #tpu.memory_space<vmem>>, vector<16x32xf32>
    %9 = arith.truncf %8 : vector<16x32xf32> to vector<16x32xbf16>
    %c0_7 = arith.constant 0 : index
    %c0_8 = arith.constant 0 : index
    %10 = vector.load %arg7[%c0_7, %c0_8] : memref<32x32xf32, #tpu.memory_space<vmem>>, vector<32x32xf32>
    %11 = arith.truncf %10 : vector<32x32xf32> to vector<32x32xbf16>
    %cst_9 = arith.constant dense<0.000000e+00> : vector<16x32xf32>
    %12 = tpu.matmul %9, %11, %cst_9 {dimension_numbers = #tpu.dot_dimension_numbers<[1], [0], [0], [1], [0, 0, 1, 1], [], []>} : vector<16x32xbf16>, vector<32x32xbf16>, vector<16x32xf32> -> vector<16x32xf32>
    %c0_10 = arith.constant 0 : index
    %c0_11 = arith.constant 0 : index
    %13 = vector.load %arg8[%c0_10, %c0_11] : memref<1x32xf32, #tpu.memory_space<vmem>>, vector<1x32xf32>
    %14 = vector.broadcast %13 : vector<1x32xf32> to vector<16x32xf32>
    %15 = arith.addf %12, %14 : vector<16x32xf32>
    %c0_12 = arith.constant 0 : index
    %c0_13 = arith.constant 0 : index
    %16 = vector.load %arg3[%c0_12, %c0_13] : memref<16x32xf32, #tpu.memory_space<vmem>>, vector<16x32xf32>
    %17 = arith.truncf %16 : vector<16x32xf32> to vector<16x32xbf16>
    %c0_14 = arith.constant 0 : index
    %c0_15 = arith.constant 0 : index
    %18 = vector.load %arg9[%c0_14, %c0_15] : memref<32x32xf32, #tpu.memory_space<vmem>>, vector<32x32xf32>
    %19 = arith.truncf %18 : vector<32x32xf32> to vector<32x32xbf16>
    %cst_16 = arith.constant dense<0.000000e+00> : vector<16x32xf32>
    %20 = tpu.matmul %17, %19, %cst_16 {dimension_numbers = #tpu.dot_dimension_numbers<[1], [0], [0], [1], [0, 0, 1, 1], [], []>} : vector<16x32xbf16>, vector<32x32xbf16>, vector<16x32xf32> -> vector<16x32xf32>
    %c0_17 = arith.constant 0 : index
    %c0_18 = arith.constant 0 : index
    %21 = vector.load %arg10[%c0_17, %c0_18] : memref<1x32xf32, #tpu.memory_space<vmem>>, vector<1x32xf32>
    %22 = vector.broadcast %21 : vector<1x32xf32> to vector<16x32xf32>
    %23 = arith.addf %20, %22 : vector<16x32xf32>
    %24 = vector.shape_cast %7 : vector<16x32xf32> to vector<2x8x32xf32>
    %25 = vector.extract_strided_slice %24 {offsets = [0, 0, 0], sizes = [2, 8, 8], strides = [1, 1, 1]} : vector<2x8x32xf32> to vector<2x8x8xf32>
    %26 = vector.extract_strided_slice %24 {offsets = [0, 0, 8], sizes = [2, 8, 8], strides = [1, 1, 1]} : vector<2x8x32xf32> to vector<2x8x8xf32>
    %27 = vector.extract_strided_slice %24 {offsets = [0, 0, 16], sizes = [2, 8, 8], strides = [1, 1, 1]} : vector<2x8x32xf32> to vector<2x8x8xf32>
    %28 = vector.extract_strided_slice %24 {offsets = [0, 0, 24], sizes = [2, 8, 8], strides = [1, 1, 1]} : vector<2x8x32xf32> to vector<2x8x8xf32>
    %29 = tpu.concatenate %25, %26, %27, %28 in 1 : vector<2x8x8xf32>, vector<2x8x8xf32>, vector<2x8x8xf32>, vector<2x8x8xf32> -> vector<2x32x8xf32>
    %30 = arith.truncf %29 : vector<2x32x8xf32> to vector<2x32x8xbf16>
    %31 = vector.shape_cast %15 : vector<16x32xf32> to vector<2x8x32xf32>
    %32 = vector.extract_strided_slice %31 {offsets = [0, 0, 0], sizes = [2, 8, 8], strides = [1, 1, 1]} : vector<2x8x32xf32> to vector<2x8x8xf32>
    %33 = vector.extract_strided_slice %31 {offsets = [0, 0, 8], sizes = [2, 8, 8], strides = [1, 1, 1]} : vector<2x8x32xf32> to vector<2x8x8xf32>
    %34 = vector.extract_strided_slice %31 {offsets = [0, 0, 16], sizes = [2, 8, 8], strides = [1, 1, 1]} : vector<2x8x32xf32> to vector<2x8x8xf32>
    %35 = vector.extract_strided_slice %31 {offsets = [0, 0, 24], sizes = [2, 8, 8], strides = [1, 1, 1]} : vector<2x8x32xf32> to vector<2x8x8xf32>
    %36 = tpu.concatenate %32, %33, %34, %35 in 1 : vector<2x8x8xf32>, vector<2x8x8xf32>, vector<2x8x8xf32>, vector<2x8x8xf32> -> vector<2x32x8xf32>
    %37 = arith.truncf %36 : vector<2x32x8xf32> to vector<2x32x8xbf16>
    %38 = vector.shape_cast %23 : vector<16x32xf32> to vector<2x8x32xf32>
    %39 = vector.extract_strided_slice %38 {offsets = [0, 0, 0], sizes = [2, 8, 8], strides = [1, 1, 1]} : vector<2x8x32xf32> to vector<2x8x8xf32>
    %40 = vector.extract_strided_slice %38 {offsets = [0, 0, 8], sizes = [2, 8, 8], strides = [1, 1, 1]} : vector<2x8x32xf32> to vector<2x8x8xf32>
    %41 = vector.extract_strided_slice %38 {offsets = [0, 0, 16], sizes = [2, 8, 8], strides = [1, 1, 1]} : vector<2x8x32xf32> to vector<2x8x8xf32>
    %42 = vector.extract_strided_slice %38 {offsets = [0, 0, 24], sizes = [2, 8, 8], strides = [1, 1, 1]} : vector<2x8x32xf32> to vector<2x8x8xf32>
    %43 = tpu.concatenate %39, %40, %41, %42 in 1 : vector<2x8x8xf32>, vector<2x8x8xf32>, vector<2x8x8xf32>, vector<2x8x8xf32> -> vector<2x32x8xf32>
    %44 = arith.truncf %43 : vector<2x32x8xf32> to vector<2x32x8xbf16>
    "tpu.trace_start"() <{level = 10 : i32, message = "brf,bcf->brc"}> : () -> ()
    %cst_19 = arith.constant dense<0.000000e+00> : vector<2x32x32xf32>
    %45 = tpu.matmul %30, %37, %cst_19 {dimension_numbers = #tpu.dot_dimension_numbers<[2], [2], [1], [1], [0, 0, 0, 1, 1, 1], [0], [0]>} : vector<2x32x8xbf16>, vector<2x32x8xbf16>, vector<2x32x32xf32> -> vector<2x32x32xf32>
    "tpu.trace_stop"() : () -> ()
    %cst_20 = arith.constant 0.353553385 : f32
    %46 = vector.broadcast %cst_20 : f32 to vector<2x32x32xf32>
    %47 = arith.mulf %45, %46 : vector<2x32x32xf32>
    %c0_21 = arith.constant 0 : index
    %c0_22 = arith.constant 0 : index
    %c0_23 = arith.constant 0 : index
    %48 = vector.load %arg4[%c0_21, %c0_22, %c0_23] : memref<2x32x32xf32, #tpu.memory_space<vmem>>, vector<2x32x32xf32>
    %49 = arith.addf %47, %48 : vector<2x32x32xf32>
    %cst_24 = arith.constant dense<0xFF800000> : vector<2x32xf32>
    %50 = vector.multi_reduction <maximumf>, %49, %cst_24 [2] : vector<2x32x32xf32> to vector<2x32xf32>
    %51 = vector.shape_cast %50 : vector<2x32xf32> to vector<2x32x1xf32>
    %52 = vector.broadcast %51 : vector<2x32x1xf32> to vector<2x32x32xf32>
    %53 = arith.subf %49, %52 : vector<2x32x32xf32>
    %54 = math.exp %53 : vector<2x32x32xf32>
    %cst_25 = arith.constant dense<0.000000e+00> : vector<2x32xf32>
    %55 = vector.multi_reduction <add>, %54, %cst_25 [2] : vector<2x32x32xf32> to vector<2x32xf32>
    %56 = vector.shape_cast %55 : vector<2x32xf32> to vector<2x32x1xf32>
    %57 = tpu.reciprocal %56 {approx = true} : vector<2x32x1xf32> -> vector<2x32x1xf32>
    %58 = vector.broadcast %57 : vector<2x32x1xf32> to vector<2x32x32xf32>
    %59 = arith.mulf %54, %58 : vector<2x32x32xf32>
    %c0_26 = arith.constant 0 : index
    %c0_27 = arith.constant 0 : index
    %c0_28 = arith.constant 0 : index
    %60 = vector.load %arg14[%c0_26, %c0_27, %c0_28] : memref<2x32x32xf32, #tpu.memory_space<vmem>>, vector<2x32x32xf32>
    tpu.vector_store %arg14[%c0_26, %c0_27, %c0_28], %59 {strides = array<i32>} : memref<2x32x32xf32, #tpu.memory_space<vmem>>, vector<2x32x32xf32>,
    %61 = arith.truncf %59 : vector<2x32x32xf32> to vector<2x32x32xbf16>
    "tpu.trace_start"() <{level = 10 : i32, message = "brc,bcf->brf"}> : () -> ()
    %cst_29 = arith.constant dense<0.000000e+00> : vector<2x32x8xf32>
    %62 = tpu.matmul %61, %44, %cst_29 {dimension_numbers = #tpu.dot_dimension_numbers<[2], [1], [1], [2], [0, 0, 0, 1, 1, 2], [0], [0]>} : vector<2x32x32xbf16>, vector<2x32x8xbf16>, vector<2x32x8xf32> -> vector<2x32x8xf32>
    "tpu.trace_stop"() : () -> ()
    %63 = vector.extract_strided_slice %62 {offsets = [0, 0, 0], sizes = [2, 8, 8], strides = [1, 1, 1]} : vector<2x32x8xf32> to vector<2x8x8xf32>
    %64 = vector.extract_strided_slice %62 {offsets = [0, 8, 0], sizes = [2, 8, 8], strides = [1, 1, 1]} : vector<2x32x8xf32> to vector<2x8x8xf32>
    %65 = vector.extract_strided_slice %62 {offsets = [0, 16, 0], sizes = [2, 8, 8], strides = [1, 1, 1]} : vector<2x32x8xf32> to vector<2x8x8xf32>
    %66 = vector.extract_strided_slice %62 {offsets = [0, 24, 0], sizes = [2, 8, 8], strides = [1, 1, 1]} : vector<2x32x8xf32> to vector<2x8x8xf32>
    %67 = tpu.concatenate %63, %64, %65, %66 in 2 : vector<2x8x8xf32>, vector<2x8x8xf32>, vector<2x8x8xf32>, vector<2x8x8xf32> -> vector<2x8x32xf32>
    %68 = vector.shape_cast %67 : vector<2x8x32xf32> to vector<16x32xf32>
    %69 = arith.truncf %68 : vector<16x32xf32> to vector<16x32xbf16>
    %c0_30 = arith.constant 0 : index
    %c0_31 = arith.constant 0 : index
    %70 = vector.load %arg11[%c0_30, %c0_31] : memref<32x32xf32, #tpu.memory_space<vmem>>, vector<32x32xf32>
    %71 = arith.truncf %70 : vector<32x32xf32> to vector<32x32xbf16>
    %cst_32 = arith.constant dense<0.000000e+00> : vector<16x32xf32>
    %72 = tpu.matmul %69, %71, %cst_32 {dimension_numbers = #tpu.dot_dimension_numbers<[1], [0], [0], [1], [0, 0, 1, 1], [], []>} : vector<16x32xbf16>, vector<32x32xbf16>, vector<16x32xf32> -> vector<16x32xf32>
    %c0_33 = arith.constant 0 : index
    %c0_34 = arith.constant 0 : index
    %73 = vector.load %arg12[%c0_33, %c0_34] : memref<1x32xf32, #tpu.memory_space<vmem>>, vector<1x32xf32>
    %74 = vector.broadcast %73 : vector<1x32xf32> to vector<16x32xf32>
    %75 = arith.addf %72, %74 : vector<16x32xf32>
    %c0_35 = arith.constant 0 : index
    %c0_36 = arith.constant 0 : index
    %76 = vector.load %arg13[%c0_35, %c0_36] : memref<16x32xf32, #tpu.memory_space<vmem>>, vector<16x32xf32>
    tpu.vector_store %arg13[%c0_35, %c0_36], %75 {strides = array<i32>} : memref<16x32xf32, #tpu.memory_space<vmem>>, vector<16x32xf32>,
    return
  }
  func.func @transform_0(%arg0: i32) -> (i32, i32) {
    %c0_i32 = arith.constant 0 : i32
    %c0_i32_0 = arith.constant 0 : i32
    return %arg0, %c0_i32 : i32, i32
  }
  func.func @transform_1(%arg0: i32) -> (i32, i32) {
    %c0_i32 = arith.constant 0 : i32
    %c0_i32_0 = arith.constant 0 : i32
    return %arg0, %c0_i32 : i32, i32
  }
  func.func @transform_2(%arg0: i32) -> (i32, i32) {
    %c0_i32 = arith.constant 0 : i32
    %c0_i32_0 = arith.constant 0 : i32
    return %arg0, %c0_i32 : i32, i32
  }
  func.func @transform_3(%arg0: i32) -> (i32, i32, i32) {
    %c0_i32 = arith.constant 0 : i32
    %c0_i32_0 = arith.constant 0 : i32
    %c0_i32_1 = arith.constant 0 : i32
    return %arg0, %c0_i32, %c0_i32_0 : i32, i32, i32
  }
  func.func @transform_4(%arg0: i32) -> (i32, i32) {
    %c0_i32 = arith.constant 0 : i32
    %c0_i32_0 = arith.constant 0 : i32
    %c0_i32_1 = arith.constant 0 : i32
    return %c0_i32, %c0_i32_0 : i32, i32
  }
  func.func @transform_5(%arg0: i32) -> (i32, i32) {
    %c0_i32 = arith.constant 0 : i32
    %c0_i32_0 = arith.constant 0 : i32
    %c0_i32_1 = arith.constant 0 : i32
    return %c0_i32, %c0_i32_0 : i32, i32
  }
  func.func @transform_6(%arg0: i32) -> (i32, i32) {
    %c0_i32 = arith.constant 0 : i32
    %c0_i32_0 = arith.constant 0 : i32
    %c0_i32_1 = arith.constant 0 : i32
    return %c0_i32, %c0_i32_0 : i32, i32
  }
  func.func @transform_7(%arg0: i32) -> (i32, i32) {
    %c0_i32 = arith.constant 0 : i32
    %c0_i32_0 = arith.constant 0 : i32
    %c0_i32_1 = arith.constant 0 : i32
    return %c0_i32, %c0_i32_0 : i32, i32
  }
  func.func @transform_8(%arg0: i32) -> (i32, i32) {
    %c0_i32 = arith.constant 0 : i32
    %c0_i32_0 = arith.constant 0 : i32
    %c0_i32_1 = arith.constant 0 : i32
    return %c0_i32, %c0_i32_0 : i32, i32
  }
  func.func @transform_9(%arg0: i32) -> (i32, i32) {
    %c0_i32 = arith.constant 0 : i32
    %c0_i32_0 = arith.constant 0 : i32
    %c0_i32_1 = arith.constant 0 : i32
    return %c0_i32, %c0_i32_0 : i32, i32
  }
  func.func @transform_10(%arg0: i32) -> (i32, i32) {
    %c0_i32 = arith.constant 0 : i32
    %c0_i32_0 = arith.constant 0 : i32
    %c0_i32_1 = arith.constant 0 : i32
    return %c0_i32, %c0_i32_0 : i32, i32
  }
  func.func @transform_11(%arg0: i32) -> (i32, i32) {
    %c0_i32 = arith.constant 0 : i32
    %c0_i32_0 = arith.constant 0 : i32
    %c0_i32_1 = arith.constant 0 : i32
    return %c0_i32, %c0_i32_0 : i32, i32
  }
  func.func @transform_12(%arg0: i32) -> (i32, i32) {
    %c0_i32 = arith.constant 0 : i32
    %c0_i32_0 = arith.constant 0 : i32
    return %arg0, %c0_i32 : i32, i32
  }
  func.func @transform_13(%arg0: i32) -> (i32, i32, i32) {
    %c0_i32 = arith.constant 0 : i32
    %c0_i32_0 = arith.constant 0 : i32
    %c0_i32_1 = arith.constant 0 : i32
    return %arg0, %c0_i32, %c0_i32_0 : i32, i32, i32
  }
}

</mosaic_0001>

<bundles_post_ra>
// kernel: tile.9
= control target key start
LH: loop header
LB: loop body
LE: loop exit
PB: predicated region body
PF: predicated region fallthrough
CT: control target
= control target key end

     0   :  { %vm1028_vm0 = vcmask 1047556   ;;  %s1571_s22 = smov 24   ;;  %vm1030_vm1 = vcmask 64512   ;;  %vm1103_vm2 = vcmask 261312   ;;  %vm1190_vm3 = vcmask 195712   ;;  %s1881_s0 = inlined_call_operand.vmem [shape: pred[2,4,8,4,8], index: 0, kind: input, shape index: {}]   ;;  %s1882_s1 = inlined_call_operand.vmem [shape: pred[2,32,32], index: 1, kind: output, shape index: {}]  }
   0x1   :  { %v1553_v0 = vld [vmem:[%s1881_s0 + $0x7] sm:$0x1]  ;;  %v1554_v1 = vld [vmem:[%s1881_s0 + $0x6] sm:$0x1]  ;;  %v1555_v2 = vld [vmem:[%s1881_s0 + $0x5] sm:$0x1] }
   0x2   :  { %v912_v3 = vunpack.c.0.s8 %v1553_v0  ;;  %v928_v4 = vunpack.c.0.s8 %v1554_v1  ;;  %v944_v5 = vunpack.c.0.s8 %v1555_v2  ;;  %v1556_v6 = vld [vmem:[%s1881_s0 + $0x4] sm:$0x1]  ;;  %v1557_v7 = vld [vmem:[%s1881_s0 + $0x3] sm:$0x1]  ;;  %v1558_v8 = vld [vmem:[%s1881_s0 + $0x2] sm:$0x1] }
   0x3   :  { %v960_v9 = vunpack.c.0.s8 %v1556_v6  ;;  %v976_v10 = vunpack.c.0.s8 %v1557_v7  ;;  %v992_v11 = vunpack.c.0.s8 %v1558_v8  ;;  %v1559_v12 = vld [vmem:[%s1881_s0 + $0x1] sm:$0x1]  ;;  %v1020_v13 = vld [vmem:[%s1881_s0] sm:$0x1]  ;;  %v1545_v16 = vld [vmem:[%s1881_s0 + $0xf] sm:$0x1] }
   0x4   :  { %917 = vst [vmem:[#allocation1 + $0x38] sm:$0xf] %v912_v3  ;;  %933 = vst [vmem:[#allocation1 + $0x30] sm:$0xf] %v928_v4  ;;  %v1007_v14 = vunpack.c.0.s8 %v1559_v12  ;;  %v1021_v15 = vunpack.c.0.s8 %v1020_v13  ;;  %v1546_v17 = vld [vmem:[%s1881_s0 + $0xe] sm:$0x1]  ;;  %v784_v19 = vunpack.c.0.s8 %v1545_v16 }
   0x5   :  { %949 = vst [vmem:[#allocation1 + $0x28] sm:$0xf] %v944_v5  ;;  %v1547_v18 = vld [vmem:[%s1881_s0 + $0xd] sm:$0x1]  ;;  %965 = vst [vmem:[#allocation1 + $0x20] sm:$0xf] %v960_v9  ;;  %v800_v20 = vunpack.c.0.s8 %v1546_v17 }
   0x6   :  { %981 = vst [vmem:[#allocation1 + $0x18] sm:$0xf] %v976_v10  ;;  %997 = vst [vmem:[#allocation1 + $0x10] sm:$0xf] %v992_v11  ;;  %v816_v21 = vunpack.c.0.s8 %v1547_v18  ;;  %v1548_v22 = vld [vmem:[%s1881_s0 + $0xc] sm:$0x1] }
   0x7   :  { %v1549_v23 = vld [vmem:[%s1881_s0 + $0xb] sm:$0x1]  ;;  %v1550_v24 = vld [vmem:[%s1881_s0 + $0xa] sm:$0x1]  ;;  %1012 = vst [vmem:[#allocation1 + $0x8] sm:$0xf] %v1007_v14  ;;  %v832_v25 = vunpack.c.0.s8 %v1548_v22 }
   0x8   :  { %1025 = vst [vmem:[#allocation1] sm:$0xf] %v1021_v15  ;;  %v848_v26 = vunpack.c.0.s8 %v1549_v23  ;;  %v864_v27 = vunpack.c.0.s8 %v1550_v24  ;;  %v1551_v28 = vld [vmem:[%s1881_s0 + $0x9] sm:$0x1]  ;;  %v1552_v29 = vld [vmem:[%s1881_s0 + $0x8] sm:$0x1] }
   0x9   :  { %v1521_v30 = vld [vmem:[%s1881_s0 + $0x27] sm:$0x1]  ;;  %789 = vst [vmem:[#allocation1 + $0x78] sm:$0xf] %v784_v19  ;;  %805 = vst [vmem:[#allocation1 + $0x70] sm:$0xf] %v800_v20  ;;  %v880_v31 = vunpack.c.0.s8 %v1551_v28  ;;  %v896_v32 = vunpack.c.0.s8 %v1552_v29 }
   0xa   :  { %821 = vst [vmem:[#allocation1 + $0x68] sm:$0xf] %v816_v21  ;;  %v400_v33 = vunpack.c.0.s8 %v1521_v30  ;;  %v1522_v34 = vld [vmem:[%s1881_s0 + $0x26] sm:$0x1]  ;;  %v1523_v35 = vld [vmem:[%s1881_s0 + $0x25] sm:$0x1] }
   0xb   :  { %v1524_v36 = vld [vmem:[%s1881_s0 + $0x24] sm:$0x1]  ;;  %837 = vst [vmem:[#allocation1 + $0x60] sm:$0xf] %v832_v25  ;;  %853 = vst [vmem:[#allocation1 + $0x58] sm:$0xf] %v848_v26  ;;  %v416_v37 = vunpack.c.0.s8 %v1522_v34  ;;  %v432_v38 = vunpack.c.0.s8 %v1523_v35 }
   0xc   :  { %869 = vst [vmem:[#allocation1 + $0x50] sm:$0xf] %v864_v27  ;;  %v448_v39 = vunpack.c.0.s8 %v1524_v36  ;;  %v1525_v40 = vld [vmem:[%s1881_s0 + $0x23] sm:$0x1]  ;;  %v1526_v41 = vld [vmem:[%s1881_s0 + $0x22] sm:$0x1] }
   0xd   :  { %v1527_v42 = vld [vmem:[%s1881_s0 + $0x21] sm:$0x1]  ;;  %885 = vst [vmem:[#allocation1 + $0x48] sm:$0xf] %v880_v31  ;;  %901 = vst [vmem:[#allocation1 + $0x40] sm:$0xf] %v896_v32  ;;  %v464_v43 = vunpack.c.0.s8 %v1525_v40  ;;  %v480_v44 = vunpack.c.0.s8 %v1526_v41 }
   0xe   :  { %405 = vst [vmem:[#allocation1 + $0x138] sm:$0xf] %v400_v33  ;;  %v496_v45 = vunpack.c.0.s8 %v1527_v42  ;;  %v1528_v46 = vld [vmem:[%s1881_s0 + $0x20] sm:$0x1]  ;;  %v1513_v47 = vld [vmem:[%s1881_s0 + $0x2f] sm:$0x1] }
   0xf   :  { %v1514_v48 = vld [vmem:[%s1881_s0 + $0x2e] sm:$0x1]  ;;  %421 = vst [vmem:[#allocation1 + $0x130] sm:$0xf] %v416_v37  ;;  %437 = vst [vmem:[#allocation1 + $0x128] sm:$0xf] %v432_v38  ;;  %v512_v49 = vunpack.c.0.s8 %v1528_v46  ;;  %v272_v50 = vunpack.c.0.s8 %v1513_v47 }
  0x10   :  { %453 = vst [vmem:[#allocation1 + $0x120] sm:$0xf] %v448_v39  ;;  %v288_v51 = vunpack.c.0.s8 %v1514_v48  ;;  %v1515_v52 = vld [vmem:[%s1881_s0 + $0x2d] sm:$0x1]  ;;  %v1516_v53 = vld [vmem:[%s1881_s0 + $0x2c] sm:$0x1] }
  0x11   :  { %v1517_v54 = vld [vmem:[%s1881_s0 + $0x2b] sm:$0x1]  ;;  %469 = vst [vmem:[#allocation1 + $0x118] sm:$0xf] %v464_v43  ;;  %485 = vst [vmem:[#allocation1 + $0x110] sm:$0xf] %v480_v44  ;;  %v304_v55 = vunpack.c.0.s8 %v1515_v52  ;;  %v320_v56 = vunpack.c.0.s8 %v1516_v53 }
  0x12   :  { %501 = vst [vmem:[#allocation1 + $0x108] sm:$0xf] %v496_v45  ;;  %v336_v57 = vunpack.c.0.s8 %v1517_v54  ;;  %v1518_v58 = vld [vmem:[%s1881_s0 + $0x2a] sm:$0x1]  ;;  %v1519_v59 = vld [vmem:[%s1881_s0 + $0x29] sm:$0x1] }
  0x13   :  { %v1520_v60 = vld [vmem:[%s1881_s0 + $0x28] sm:$0x1]  ;;  %v1098_v61 = vld [vmem:[#allocation1 + $0x3] ss:$8 sm:$0xf0]   ;;  %v352_v62 = vunpack.c.0.s8 %v1518_v58  ;;  %v368_v63 = vunpack.c.0.s8 %v1519_v59  ;;  %vm1277_vm4 = vcmask 130112  }
  0x14   :  { %517 = vst [vmem:[#allocation1 + $0x100] sm:$0xf] %v512_v49  ;;  %277 = vst [vmem:[#allocation1 + $0x178] sm:$0xf] %v272_v50  ;;  %v384_v0 = vunpack.c.0.s8 %v1520_v60  ;;  %v1537_v1 = vld [vmem:[%s1881_s0 + $0x17] sm:$0x1] }
  0x15   :  { %293 = vst [vmem:[#allocation1 + $0x170] sm:$0xf] %v288_v51  ;;  %v1096_v2 = vld [vmem:[#allocation1 + $0x3] ss:$8 sm:$0xf]   ;;  %v656_v3 = vunpack.c.0.s8 %v1537_v1 }
  0x16   :  { %309 = vst [vmem:[#allocation1 + $0x168] sm:$0xf] %v304_v55  ;;  %325 = vst [vmem:[#allocation1 + $0x160] sm:$0xf] %v320_v56  ;;  %v1538_v4 = vld [vmem:[%s1881_s0 + $0x16] sm:$0x1]  ;;  %v1100_v5 = vsel %vm1028_vm0, %v1098_v61, %v1096_v2 }
  0x17   :  { %341 = vst [vmem:[#allocation1 + $0x158] sm:$0xf] %v336_v57  ;;  %357 = vst [vmem:[#allocation1 + $0x150] sm:$0xf] %v352_v62  ;;  %v672_v6 = vunpack.c.0.s8 %v1538_v4  ;;  %v1539_v7 = vld [vmem:[%s1881_s0 + $0x15] sm:$0x1]  ;;  %1101 = vrot.lane.b32.xlu0 %v1100_v5, %s1571_s22 }
  0x18   :  { %373 = vst [vmem:[#allocation1 + $0x148] sm:$0xf] %v368_v63  ;;  %389 = vst [vmem:[#allocation1 + $0x140] sm:$0xf] %v384_v0  ;;  %v1540_v8 = vld [vmem:[%s1881_s0 + $0x14] sm:$0x1]  ;;  %v688_v11 = vunpack.c.0.s8 %v1539_v7 }
  0x19   :  { %v1541_v9 = vld [vmem:[%s1881_s0 + $0x13] sm:$0x1]  ;;  %661 = vst [vmem:[#allocation1 + $0xb8] sm:$0xf] %v656_v3  ;;  %v704_v12 = vunpack.c.0.s8 %v1540_v8  ;;  %v1542_v14 = vld [vmem:[%s1881_s0 + $0x12] sm:$0x1] }
  0x1a   :  { %v1119_v10 = vld [vmem:[#allocation1 + $0x43] ss:$8 sm:$0xf0]   ;;  %v720_v13 = vunpack.c.0.s8 %v1541_v9  ;;  %677 = vst [vmem:[#allocation1 + $0xb0] sm:$0xf] %v672_v6  ;;  %v736_v16 = vunpack.c.0.s8 %v1542_v14 }
  0x1b   :  { %v1117_v15 = vld [vmem:[#allocation1 + $0x43] ss:$8 sm:$0xf]   ;;  %v1543_v17 = vld [vmem:[%s1881_s0 + $0x11] sm:$0x1] }
  0x1c   :  { %v1121_v18 = vsel %vm1028_vm0, %v1119_v10, %v1117_v15  ;;  %v1108_v19 = vld [vmem:[#allocation1 + $0x103] ss:$8 sm:$0xf0]   ;;  %693 = vst [vmem:[#allocation1 + $0xa8] sm:$0xf] %v688_v11  ;;  %v752_v20 = vunpack.c.0.s8 %v1543_v17 }
  0x1d   :  { %709 = vst [vmem:[#allocation1 + $0xa0] sm:$0xf] %v704_v12  ;;  %725 = vst [vmem:[#allocation1 + $0x98] sm:$0xf] %v720_v13  ;;  %v1544_v21 = vld [vmem:[%s1881_s0 + $0x10] sm:$0x1]  ;;  %1122 = vrot.lane.b32.xlu1 %v1121_v18, %s1571_s22 }
  0x1e   :  { %741 = vst [vmem:[#allocation1 + $0x90] sm:$0xf] %v736_v16  ;;  %v768_v22 = vunpack.c.0.s8 %v1544_v21  ;;  %v1505_v23 = vld [vmem:[%s1881_s0 + $0x37] sm:$0x1]  ;;  %v1506_v24 = vld [vmem:[%s1881_s0 + $0x36] sm:$0x1] }
  0x1f   :  { %v1507_v25 = vld [vmem:[%s1881_s0 + $0x35] sm:$0x1]  ;;  %v1106_v26 = vld [vmem:[#allocation1 + $0x103] ss:$8 sm:$0xf]   ;;  %v144_v27 = vunpack.c.0.s8 %v1505_v23  ;;  %v160_v28 = vunpack.c.0.s8 %v1506_v24 }
  0x20   :  { %757 = vst [vmem:[#allocation1 + $0x88] sm:$0xf] %v752_v20  ;;  %v176_v29 = vunpack.c.0.s8 %v1507_v25  ;;  %v1508_v30 = vld [vmem:[%s1881_s0 + $0x34] sm:$0x1]  ;;  %v1110_v31 = vsel %vm1028_vm0, %v1108_v19, %v1106_v26  ;;  %773 = vst [vmem:[#allocation1 + $0x80] sm:$0xf] %v768_v22 }
  0x21   :  { %v1130_v32 = vld [vmem:[#allocation1 + $0x143] ss:$8 sm:$0xf0]   ;;  %v192_v33 = vunpack.c.0.s8 %v1508_v30  ;;  %1111 = vrot.lane.b32.xlu0 %v1110_v31, %s1571_s22  ;;  %149 = vst [vmem:[#allocation1 + $0x1b8] sm:$0xf] %v144_v27 }
  0x22   :  { %v1509_v34 = vld [vmem:[%s1881_s0 + $0x33] sm:$0x1]  ;;  %165 = vst [vmem:[#allocation1 + $0x1b0] sm:$0xf] %v160_v28  ;;  %181 = vst [vmem:[#allocation1 + $0x1a8] sm:$0xf] %v176_v29 }
  0x23   :  { %v1128_v35 = vld [vmem:[#allocation1 + $0x143] ss:$8 sm:$0xf]   ;;  %v208_v36 = vunpack.c.0.s8 %v1509_v34  ;;  %v1510_v37 = vld [vmem:[%s1881_s0 + $0x32] sm:$0x1] }
  0x24   :  { %v1132_v38 = vsel %vm1028_vm0, %v1130_v32, %v1128_v35  ;;  %197 = vst [vmem:[#allocation1 + $0x1a0] sm:$0xf] %v192_v33  ;;  %v224_v39 = vunpack.c.0.s8 %v1510_v37  ;;  %v1511_v40 = vld [vmem:[%s1881_s0 + $0x31] sm:$0x1]  ;;  %v1512_v41 = vld [vmem:[%s1881_s0 + $0x30] sm:$0x1] }
  0x25   :  { %v1529_v42 = vld [vmem:[%s1881_s0 + $0x1f] sm:$0x1]  ;;  %1133 = vrot.lane.b32.xlu1 %v1132_v38, %s1571_s22  ;;  %213 = vst [vmem:[#allocation1 + $0x198] sm:$0xf] %v208_v36  ;;  %v240_v43 = vunpack.c.0.s8 %v1511_v40  ;;  %v256_v44 = vunpack.c.0.s8 %v1512_v41  ;;  %v1530_v46 = vld [vmem:[%s1881_s0 + $0x1e] sm:$0x1] }
  0x26   :  { %v528_v45 = vunpack.c.0.s8 %v1529_v42  ;;  %v1531_v47 = vld [vmem:[%s1881_s0 + $0x1d] sm:$0x1]  ;;  %v1532_v48 = vld [vmem:[%s1881_s0 + $0x1c] sm:$0x1]  ;;  %229 = vst [vmem:[#allocation1 + $0x190] sm:$0xf] %v224_v39  ;;  %v544_v50 = vunpack.c.0.s8 %v1530_v46 }
  0x27   :  { %v1141_v49 = vld [vmem:[#allocation1 + $0x83] ss:$8 sm:$0xf0]   ;;  %v560_v51 = vunpack.c.0.s8 %v1531_v47  ;;  %v576_v52 = vunpack.c.0.s8 %v1532_v48  ;;  %245 = vst [vmem:[#allocation1 + $0x188] sm:$0xf] %v240_v43 }
  0x28   :  { %v1533_v53 = vld [vmem:[%s1881_s0 + $0x1b] sm:$0x1]  ;;  %261 = vst [vmem:[#allocation1 + $0x180] sm:$0xf] %v256_v44  ;;  %533 = vst [vmem:[#allocation1 + $0xf8] sm:$0xf] %v528_v45 }
  0x29   :  { %v592_v54 = vunpack.c.0.s8 %v1533_v53  ;;  %v1534_v55 = vld [vmem:[%s1881_s0 + $0x1a] sm:$0x1]  ;;  %v1535_v56 = vld [vmem:[%s1881_s0 + $0x19] sm:$0x1]  ;;  %v1536_v57 = vld [vmem:[%s1881_s0 + $0x18] sm:$0x1] }
  0x2a   :  { %549 = vst [vmem:[#allocation1 + $0xf0] sm:$0xf] %v544_v50  ;;  %565 = vst [vmem:[#allocation1 + $0xe8] sm:$0xf] %v560_v51  ;;  %v608_v58 = vunpack.c.0.s8 %v1534_v55  ;;  %v624_v59 = vunpack.c.0.s8 %v1535_v56  ;;  %v640_v60 = vunpack.c.0.s8 %v1536_v57  ;;  %v1497_v61 = vld [vmem:[%s1881_s0 + $0x3f] sm:$0x1] }
  0x2b   :  { %581 = vst [vmem:[#allocation1 + $0xe0] sm:$0xf] %v576_v52  ;;  %v1498_v62 = vld [vmem:[%s1881_s0 + $0x3e] sm:$0x1]  ;;  %v1499_v63 = vld [vmem:[%s1881_s0 + $0x3d] sm:$0x1]  ;;  %v16_v1 = vunpack.c.0.s8 %v1497_v61 }
  0x2c   :  { %v1139_v0 = vld [vmem:[#allocation1 + $0x83] ss:$8 sm:$0xf]   ;;  %597 = vst [vmem:[#allocation1 + $0xd8] sm:$0xf] %v592_v54  ;;  %v32_v2 = vunpack.c.0.s8 %v1498_v62  ;;  %v48_v3 = vunpack.c.0.s8 %v1499_v63 }
  0x2d   :  { %v1500_v4 = vld [vmem:[%s1881_s0 + $0x3c] sm:$0x1]  ;;  %v1143_v5 = vsel %vm1028_vm0, %v1141_v49, %v1139_v0  ;;  %613 = vst [vmem:[#allocation1 + $0xd0] sm:$0xf] %v608_v58  ;;  %629 = vst [vmem:[#allocation1 + $0xc8] sm:$0xf] %v624_v59 }
  0x2e   :  { %645 = vst [vmem:[#allocation1 + $0xc0] sm:$0xf] %v640_v60  ;;  %v64_v6 = vunpack.c.0.s8 %v1500_v4  ;;  %v1501_v7 = vld [vmem:[%s1881_s0 + $0x3b] sm:$0x1]  ;;  %v1502_v8 = vld [vmem:[%s1881_s0 + $0x3a] sm:$0x1]  ;;  %1144 = vrot.lane.b32.xlu0 %v1143_v5, %s1571_s22 }
  0x2f   :  { %v1503_v9 = vld [vmem:[%s1881_s0 + $0x39] sm:$0x1]  ;;  %21 = vst [vmem:[#allocation1 + $0x1f8] sm:$0xf] %v16_v1  ;;  %37 = vst [vmem:[#allocation1 + $0x1f0] sm:$0xf] %v32_v2  ;;  %v80_v10 = vunpack.c.0.s8 %v1501_v7  ;;  %v96_v11 = vunpack.c.0.s8 %v1502_v8 }
  0x30   :  { %53 = vst [vmem:[#allocation1 + $0x1e8] sm:$0xf] %v48_v3  ;;  %v112_v12 = vunpack.c.0.s8 %v1503_v9  ;;  %v1504_v13 = vld [vmem:[%s1881_s0 + $0x38] sm:$0x1]  ;;  %69 = vst [vmem:[#allocation1 + $0x1e0] sm:$0xf] %v64_v6 }
  0x31   :  { %v1152_v14 = vld [vmem:[#allocation1 + $0x183] ss:$8 sm:$0xf0]   ;;  %v128_v15 = vunpack.c.0.s8 %v1504_v13  ;;  %85 = vst [vmem:[#allocation1 + $0x1d8] sm:$0xf] %v80_v10  ;;  %s1572_s0 = smov 16  }
  0x32   :  { %101 = vst [vmem:[#allocation1 + $0x1d0] sm:$0xf] %v96_v11  ;;  %117 = vst [vmem:[#allocation1 + $0x1c8] sm:$0xf] %v112_v12 }
  0x33   :  { %v1150_v16 = vld [vmem:[#allocation1 + $0x183] ss:$8 sm:$0xf]   ;;  %133 = vst [vmem:[#allocation1 + $0x1c0] sm:$0xf] %v128_v15 }
  0x34   :  { %v1154_v17 = vsel %vm1028_vm0, %v1152_v14, %v1150_v16  ;;  %v1163_v18 = vld [vmem:[#allocation1 + $0xc3] ss:$8 sm:$0xf0]   ;;  %v1183_v19 = vld [vmem:[#allocation1 + $0x2] ss:$8 sm:$0xf]  }
  0x35   :  { %1155 = vrot.lane.b32.xlu1 %v1154_v17, %s1571_s22  ;;  %v1161_v20 = vld [vmem:[#allocation1 + $0xc3] ss:$8 sm:$0xf]   ;;  %v1185_v21 = vld [vmem:[#allocation1 + $0x2] ss:$8 sm:$0xf0]  }
  0x36   :  { %v1165_v22 = vsel %vm1028_vm0, %v1163_v18, %v1161_v20  ;;  %v1193_v24 = vld [vmem:[#allocation1 + $0x102] ss:$8 sm:$0xf]   ;;  %v1187_v25 = vsel %vm1028_vm0, %v1185_v21, %v1183_v19  ;;  %v1026_v43 = vld [vmem:[#allocation1] ss:$8 sm:$0xf]  }
  0x37   :  { %1166 = vrot.lane.b32.xlu0 %v1165_v22, %s1571_s22  ;;  %v1174_v23 = vld [vmem:[#allocation1 + $0x1c3] ss:$8 sm:$0xf0]   ;;  %v1195_v26 = vld [vmem:[#allocation1 + $0x102] ss:$8 sm:$0xf0]  }
  0x38   :  { %v1204_v27 = vld [vmem:[#allocation1 + $0x42] ss:$8 sm:$0xf]   ;;  %v1197_v31 = vsel %vm1028_vm0, %v1195_v26, %v1193_v24  ;;  %v1270_v46 = vld [vmem:[#allocation1 + $0x1] ss:$8 sm:$0xf]  }
  0x39   :  { %v1206_v29 = vld [vmem:[#allocation1 + $0x42] ss:$8 sm:$0xf0]   ;;  %v1272_v47 = vld [vmem:[#allocation1 + $0x1] ss:$8 sm:$0xf0]  }
  0x3a   :  { %v1172_v28 = vld [vmem:[#allocation1 + $0x1c3] ss:$8 sm:$0xf]   ;;  %v1208_v32 = vsel %vm1028_vm0, %v1206_v29, %v1204_v27  ;;  %v1215_v33 = vld [vmem:[#allocation1 + $0x142] ss:$8 sm:$0xf]   ;;  %v1274_v5 = vsel %vm1028_vm0, %v1272_v47, %v1270_v46 }
  0x3b   :  { %v1176_v30 = vsel %vm1028_vm0, %v1174_v23, %v1172_v28  ;;  %1188 = vrot.lane.b32.xlu0 %v1187_v25, %s1572_s0  ;;  %v1217_v34 = vld [vmem:[#allocation1 + $0x142] ss:$8 sm:$0xf0]   ;;  %v1027_v48 = vld [vmem:[#allocation1] ss:$8 sm:$0xf0]  }
  0x3c   :  { %1177 = vrot.lane.b32.xlu1 %v1176_v30, %s1571_s22  ;;  %v1226_v35 = vld [vmem:[#allocation1 + $0x82] ss:$8 sm:$0xf]   ;;  %v1219_v37 = vsel %vm1028_vm0, %v1217_v34, %v1215_v33  ;;  %v1033_v49 = vld [vmem:[#allocation1 + $0x40] ss:$8 sm:$0xf]   ;;  %v1029_v52 = vsel %vm1028_vm0, %v1027_v48, %v1026_v43 }
  0x3d   :  { %v1228_v36 = vld [vmem:[#allocation1 + $0x82] ss:$8 sm:$0xf0]   ;;  %v1035_v53 = vld [vmem:[#allocation1 + $0x40] ss:$8 sm:$0xf0]  }
  0x3e   :  { %v1230_v38 = vsel %vm1028_vm0, %v1228_v36, %v1226_v35  ;;  %v1237_v39 = vld [vmem:[#allocation1 + $0x182] ss:$8 sm:$0xf]   ;;  %v1060_v54 = vld [vmem:[#allocation1 + $0x100] ss:$8 sm:$0xf]   ;;  %v1037_v55 = vsel %vm1028_vm0, %v1035_v53, %v1033_v49 }
  0x3f   :  { %1209 = vrot.lane.b32.xlu0 %v1208_v32, %s1572_s0  ;;  %v1239_v40 = vld [vmem:[#allocation1 + $0x182] ss:$8 sm:$0xf0]   ;;  %1031 = vst.msk [vmem:[#allocation0] sm:$0xff] %vm1030_vm1, %v1029_v52   ;;  %1040 = vst.msk [vmem:[#allocation0 + $0x8] sm:$0xff] %vm1030_vm1, %v1037_v55   ;;  %s1573_s22 = smov 8  }
  0x40   :  { %1198 = vrot.lane.b32.xlu1 %v1197_v31, %s1572_s0  ;;  %v1248_v41 = vld [vmem:[#allocation1 + $0xc2] ss:$8 sm:$0xf]   ;;  %v1241_v50 = vsel %vm1028_vm0, %v1239_v40, %v1237_v39  ;;  %v1062_v56 = vld [vmem:[#allocation1 + $0x100] ss:$8 sm:$0xf0]  }
  0x41   :  { %v1250_v42 = vld [vmem:[#allocation1 + $0xc2] ss:$8 sm:$0xf0]   ;;  %v1069_v57 = vld [vmem:[#allocation1 + $0x140] ss:$8 sm:$0xf]   ;;  %v1064_v58 = vsel %vm1028_vm0, %v1062_v56, %v1060_v54 }
  0x42   :  { %v1259_v44 = vld [vmem:[#allocation1 + $0x1c2] ss:$8 sm:$0xf]   ;;  %v1252_v51 = vsel %vm1028_vm0, %v1250_v42, %v1248_v41  ;;  %v1071_v59 = vld [vmem:[#allocation1 + $0x140] ss:$8 sm:$0xf0]  }
  0x43   :  { %1231 = vrot.lane.b32.xlu0 %v1230_v38, %s1572_s0  ;;  %v1261_v45 = vld [vmem:[#allocation1 + $0x1c2] ss:$8 sm:$0xf0]   ;;  %v1042_v60 = vld [vmem:[#allocation1 + $0x80] ss:$8 sm:$0xf]   ;;  %v1073_v1 = vsel %vm1028_vm0, %v1071_v59, %v1069_v57 }
  0x44   :  { %1220 = vrot.lane.b32.xlu1 %v1219_v37, %s1572_s0  ;;  %v1280_v61 = vld [vmem:[#allocation1 + $0x101] ss:$8 sm:$0xf]   ;;  %1067 = vst.msk [vmem:[#allocation0 + $0x20] sm:$0xff] %vm1030_vm1, %v1064_v58   ;;  %v1263_v4 = vsel %vm1028_vm0, %v1261_v45, %v1259_v44  ;;  %1076 = vst.msk [vmem:[#allocation0 + $0x28] sm:$0xff] %vm1030_vm1, %v1073_v1   ;;  %v1574_v54 = vmov 0  }
  0x45   :  { %v1282_v62 = vld [vmem:[#allocation1 + $0x101] ss:$8 sm:$0xf0]   ;;  %v1044_v2 = vld [vmem:[#allocation1 + $0x80] ss:$8 sm:$0xf0]  }
  0x46   :  { %v1291_v63 = vld [vmem:[#allocation1 + $0x41] ss:$8 sm:$0xf]   ;;  %v1078_v3 = vld [vmem:[#allocation1 + $0x180] ss:$8 sm:$0xf]   ;;  %v1046_v6 = vsel %vm1028_vm0, %v1044_v2, %v1042_v60  ;;  %v1284_v15 = vsel %vm1028_vm0, %v1282_v62, %v1280_v61 }
  0x47   :  { %1253 = vrot.lane.b32.xlu0 %v1252_v51, %s1572_s0  ;;  %v1293_v0 = vld [vmem:[#allocation1 + $0x41] ss:$8 sm:$0xf0]   ;;  %v1080_v7 = vld [vmem:[#allocation1 + $0x180] ss:$8 sm:$0xf0]  }
  0x48   :  { %1242 = vrot.lane.b32.xlu1 %v1241_v50, %s1572_s0  ;;  %v1051_v8 = vld [vmem:[#allocation1 + $0xc0] ss:$8 sm:$0xf]   ;;  %1049 = vst.msk [vmem:[#allocation0 + $0x10] sm:$0xff] %vm1030_vm1, %v1046_v6   ;;  %v1082_v9 = vsel %vm1028_vm0, %v1080_v7, %v1078_v3  ;;  %v1295_v16 = vsel %vm1028_vm0, %v1293_v0, %v1291_v63 }
  0x49   :  { %v1053_v10 = vld [vmem:[#allocation1 + $0xc0] ss:$8 sm:$0xf0]   ;;  %1085 = vst.msk [vmem:[#allocation0 + $0x30] sm:$0xff] %vm1030_vm1, %v1082_v9  }
  0x4a   :  { %v1087_v11 = vld [vmem:[#allocation1 + $0x1c0] ss:$8 sm:$0xf]   ;;  %v1055_v12 = vsel %vm1028_vm0, %v1053_v10, %v1051_v8  ;;  %v1302_v17 = vld [vmem:[#allocation1 + $0x141] ss:$8 sm:$0xf]  }
  0x4b   :  { %v1089_v13 = vld [vmem:[#allocation1 + $0x1c0] ss:$8 sm:$0xf0]   ;;  %1275 = vrot.lane.b32.xlu0 %v1274_v5, %s1573_s22  ;;  %1058 = vst.msk [vmem:[#allocation0 + $0x18] sm:$0xff] %vm1030_vm1, %v1055_v12  }
  0x4c   :  { %1264 = vrot.lane.b32.xlu1 %v1263_v4, %s1572_s0  ;;  %v1091_v14 = vsel %vm1028_vm0, %v1089_v13, %v1087_v11  ;;  %v1304_v18 = vld [vmem:[#allocation1 + $0x141] ss:$8 sm:$0xf0]  }
  0x4d   :  { %1094 = vst.msk [vmem:[#allocation0 + $0x38] sm:$0xff] %vm1030_vm1, %v1091_v14   ;;  %v1313_v19 = vld [vmem:[#allocation1 + $0x81] ss:$8 sm:$0xf]   ;;  %v1306_v21 = vsel %vm1028_vm0, %v1304_v18, %v1302_v17 }
  0x4e   :  { %v1315_v20 = vld [vmem:[#allocation1 + $0x81] ss:$8 sm:$0xf0]  }
  0x4f   :  { %1296 = vrot.lane.b32.xlu0 %v1295_v16, %s1573_s22  ;;  %v1317_v22 = vsel %vm1028_vm0, %v1315_v20, %v1313_v19  ;;  %v1324_v23 = vld [vmem:[#allocation1 + $0x181] ss:$8 sm:$0xf]  }
  0x50   :  { %1285 = vrot.lane.b32.xlu1 %v1284_v15, %s1573_s22  ;;  %v1326_v24 = vld [vmem:[#allocation1 + $0x181] ss:$8 sm:$0xf0]  }
  0x51   :  { %v1335_v25 = vld [vmem:[#allocation1 + $0xc1] ss:$8 sm:$0xf]   ;;  %v1328_v27 = vsel %vm1028_vm0, %v1326_v24, %v1324_v23 }
  0x52   :  { %v1337_v26 = vld [vmem:[#allocation1 + $0xc1] ss:$8 sm:$0xf0]  }
  0x53   :  { %1318 = vrot.lane.b32.xlu0 %v1317_v22, %s1573_s22  ;;  %v1339_v28 = vsel %vm1028_vm0, %v1337_v26, %v1335_v25  ;;  %v1346_v29 = vld [vmem:[#allocation1 + $0x1c1] ss:$8 sm:$0xf]  }
  0x54   :  { %1307 = vrot.lane.b32.xlu1 %v1306_v21, %s1573_s22  ;;  %v1348_v30 = vld [vmem:[#allocation1 + $0x1c1] ss:$8 sm:$0xf0]  }
  0x55   :  { %v1350_v31 = vsel %vm1028_vm0, %v1348_v30, %v1346_v29 }
  0x57   :  { %1340 = vrot.lane.b32.xlu0 %v1339_v28, %s1573_s22 }
  0x58   :  { %1329 = vrot.lane.b32.xlu1 %v1328_v27, %s1573_s22 }
  0x5c   :  { %1351 = vrot.lane.b32.xlu1 %v1350_v31, %s1573_s22 }
  0x89   :  { %v1102_v32 = vpop.permute.xlu0 %1101  }
  0x8a   :  { %1104 = vst.msk [vmem:[#allocation0] sm:$0xff] %vm1103_vm2, %v1102_v32  }
  0x8f   :  { %v1123_v33 = vpop.permute.xlu1 %1122  }
  0x90   :  { %1126 = vst.msk [vmem:[#allocation0 + $0x8] sm:$0xff] %vm1103_vm2, %v1123_v33  }
  0x93   :  { %v1112_v34 = vpop.permute.xlu0 %1111  }
  0x94   :  { %1115 = vst.msk [vmem:[#allocation0 + $0x20] sm:$0xff] %vm1103_vm2, %v1112_v34  }
  0x97   :  { %v1134_v35 = vpop.permute.xlu1 %1133  }
  0x98   :  { %1137 = vst.msk [vmem:[#allocation0 + $0x28] sm:$0xff] %vm1103_vm2, %v1134_v35  }
  0xa0   :  { %v1145_v36 = vpop.permute.xlu0 %1144  }
  0xa1   :  { %1148 = vst.msk [vmem:[#allocation0 + $0x10] sm:$0xff] %vm1103_vm2, %v1145_v36  }
  0xa7   :  { %v1156_v37 = vpop.permute.xlu1 %1155  }
  0xa8   :  { %1159 = vst.msk [vmem:[#allocation0 + $0x30] sm:$0xff] %vm1103_vm2, %v1156_v37  }
  0xa9   :  { %v1167_v38 = vpop.permute.xlu0 %1166  }
  0xaa   :  { %1170 = vst.msk [vmem:[#allocation0 + $0x18] sm:$0xff] %vm1103_vm2, %v1167_v38  }
  0xad   :  { %v1189_v40 = vpop.permute.xlu0 %1188  }
  0xae   :  { %v1178_v39 = vpop.permute.xlu1 %1177   ;;  %1191 = vst.msk [vmem:[#allocation0] sm:$0xff] %vm1190_vm3, %v1189_v40  }
  0xaf   :  { %1181 = vst.msk [vmem:[#allocation0 + $0x38] sm:$0xff] %vm1103_vm2, %v1178_v39  }
  0xb1   :  { %v1210_v42 = vpop.permute.xlu0 %1209  }
  0xb2   :  { %v1199_v41 = vpop.permute.xlu1 %1198   ;;  %1213 = vst.msk [vmem:[#allocation0 + $0x8] sm:$0xff] %vm1190_vm3, %v1210_v42  }
  0xb3   :  { %1202 = vst.msk [vmem:[#allocation0 + $0x20] sm:$0xff] %vm1190_vm3, %v1199_v41  }
  0xb5   :  { %v1232_v44 = vpop.permute.xlu0 %1231  }
  0xb6   :  { %v1221_v43 = vpop.permute.xlu1 %1220   ;;  %1235 = vst.msk [vmem:[#allocation0 + $0x10] sm:$0xff] %vm1190_vm3, %v1232_v44  }
  0xb7   :  { %1224 = vst.msk [vmem:[#allocation0 + $0x28] sm:$0xff] %vm1190_vm3, %v1221_v43  }
  0xb9   :  { %v1254_v46 = vpop.permute.xlu0 %1253  }
  0xba   :  { %v1243_v45 = vpop.permute.xlu1 %1242   ;;  %1257 = vst.msk [vmem:[#allocation0 + $0x18] sm:$0xff] %vm1190_vm3, %v1254_v46  }
  0xbb   :  { %1246 = vst.msk [vmem:[#allocation0 + $0x30] sm:$0xff] %vm1190_vm3, %v1243_v45  }
  0xbd   :  { %v1276_v48 = vpop.permute.xlu0 %1275  }
  0xbe   :  { %v1265_v47 = vpop.permute.xlu1 %1264   ;;  %1278 = vst.msk [vmem:[#allocation0] sm:$0xff] %vm1277_vm4, %v1276_v48  }
  0xbf   :  { %1268 = vst.msk [vmem:[#allocation0 + $0x38] sm:$0xff] %vm1190_vm3, %v1265_v47  }
  0xc1   :  { %v1297_v50 = vpop.permute.xlu0 %1296  }
  0xc2   :  { %v1286_v49 = vpop.permute.xlu1 %1285   ;;  %1300 = vst.msk [vmem:[#allocation0 + $0x8] sm:$0xff] %vm1277_vm4, %v1297_v50  }
  0xc3   :  { %1289 = vst.msk [vmem:[#allocation0 + $0x20] sm:$0xff] %vm1277_vm4, %v1286_v49  }
  0xc5   :  { %v1361_v51 = vld [vmem:[#allocation0] sm:$0xff]  ;;  %v1319_v53 = vpop.permute.xlu0 %1318  }
  0xc6   :  { %v1308_v52 = vpop.permute.xlu1 %1307   ;;  %v1364_v55 = vpack.c.b16 %v1574_v54, %v1361_v51  ;;  %1322 = vst.msk [vmem:[#allocation0 + $0x10] sm:$0xff] %vm1277_vm4, %v1319_v53  }
  0xc7   :  { %1311 = vst.msk [vmem:[#allocation0 + $0x28] sm:$0xff] %vm1277_vm4, %v1308_v52  }
  0xc8   :  { %v1365_v56 = vpack.c.b8 %v1574_v54, %v1364_v55 }
  0xc9   :  { %v1368_v58 = vld [vmem:[#allocation0 + $0x8] sm:$0xff]  ;;  %v1341_v60 = vpop.permute.xlu0 %1340  }
  0xca   :  { %v1394_v57 = vld [vmem:[#allocation0 + $0x20] sm:$0xff]  ;;  %v1330_v59 = vpop.permute.xlu1 %1329   ;;  %1366 = vst [vmem:[%s1882_s1] sm:$0x3] %v1365_v56  ;;  %v1372_v62 = vpack.c.b16 %v1574_v54, %v1368_v58  ;;  %1344 = vst.msk [vmem:[#allocation0 + $0x18] sm:$0xff] %vm1277_vm4, %v1341_v60  }
  0xcb   :  { %v1399_v61 = vpack.c.b16 %v1574_v54, %v1394_v57  ;;  %1333 = vst.msk [vmem:[#allocation0 + $0x30] sm:$0xff] %vm1277_vm4, %v1330_v59  }
  0xcc   :  { %v1373_v0 = vpack.c.b8 %v1574_v54, %v1372_v62 }
  0xcd   :  { %v1400_v63 = vpack.c.b8 %v1574_v54, %v1399_v61  ;;  %v1376_v2 = vld [vmem:[#allocation0 + $0x10] sm:$0xff] }
  0xce   :  { %v1403_v1 = vld [vmem:[#allocation0 + $0x28] sm:$0xff]  ;;  %v1352_v3 = vpop.permute.xlu1 %1351   ;;  %1560 = vst [vmem:[%s1882_s1 + $0x2] sm:$0x3] %v1373_v0  ;;  %v1381_v5 = vpack.c.b16 %v1574_v54, %v1376_v2 }
  0xcf   :  { %1563 = vst [vmem:[%s1882_s1 + $0x8] sm:$0x3] %v1400_v63  ;;  %v1408_v4 = vpack.c.b16 %v1574_v54, %v1403_v1  ;;  %1355 = vst.msk [vmem:[#allocation0 + $0x38] sm:$0xff] %vm1277_vm4, %v1352_v3  }
  0xd0   :  { %v1382_v7 = vpack.c.b8 %v1574_v54, %v1381_v5 }
  0xd1   :  { %v1409_v6 = vpack.c.b8 %v1574_v54, %v1408_v4  ;;  %v1385_v9 = vld [vmem:[#allocation0 + $0x18] sm:$0xff] }
  0xd2   :  { %v1412_v8 = vld [vmem:[#allocation0 + $0x30] sm:$0xff]  ;;  %1561 = vst [vmem:[%s1882_s1 + $0x4] sm:$0x3] %v1382_v7  ;;  %v1390_v11 = vpack.c.b16 %v1574_v54, %v1385_v9 }
  0xd3   :  { %1564 = vst [vmem:[%s1882_s1 + $0xa] sm:$0x3] %v1409_v6  ;;  %v1417_v10 = vpack.c.b16 %v1574_v54, %v1412_v8 }
  0xd4   :  { %v1391_v13 = vpack.c.b8 %v1574_v54, %v1390_v11 }
  0xd5   :  { %v1418_v12 = vpack.c.b8 %v1574_v54, %v1417_v10 }
  0xd6   :  { %v1421_v14 = vld [vmem:[#allocation0 + $0x38] sm:$0xff]  ;;  %1562 = vst [vmem:[%s1882_s1 + $0x6] sm:$0x3] %v1391_v13 }
  0xd7   :  { %1565 = vst [vmem:[%s1882_s1 + $0xc] sm:$0x3] %v1418_v12  ;;  %v1426_v15 = vpack.c.b16 %v1574_v54, %v1421_v14 }
  0xd9   :  { %v1427_v16 = vpack.c.b8 %v1574_v54, %v1426_v15 }
  0xdb   :  { %1566 = vst [vmem:[%s1882_s1 + $0xe] sm:$0x3] %v1427_v16 }

// kernel: multi_head_attention.1
= control target key start
LH: loop header
LB: loop body
LE: loop exit
PB: predicated region body
PF: predicated region fallthrough
CT: control target
= control target key end

     0   :  { %v1003_v3 = vmov 0.0   ;;  %vm1004_vm0 = vmmov 0   ;;  %s1303_s0 = inlined_call_operand.vmem [shape: f32[16,32], index: 0, kind: input, shape index: {}]   ;;  %s1304_s1 = inlined_call_operand.vmem [shape: f32[16,32], index: 1, kind: input, shape index: {}]   ;;  %s1305_s2 = inlined_call_operand.vmem [shape: f32[16,32], index: 2, kind: input, shape index: {}]   ;;  %s1306_s3 = inlined_call_operand.vmem [shape: f32[2,32,32], index: 3, kind: input, shape index: {}]   ;;  %s1307_s4 = inlined_call_operand.vmem [shape: f32[32,32], index: 4, kind: input, shape index: {}]   ;;  %s1308_s5 = inlined_call_operand.vmem [shape: f32[1,32], index: 5, kind: input, shape index: {}]   ;;  %s1309_s6 = inlined_call_operand.vmem [shape: f32[32,32], index: 6, kind: input, shape index: {}]   ;;  %s1310_s7 = inlined_call_operand.vmem [shape: f32[1,32], index: 7, kind: input, shape index: {}]   ;;  %s1311_s8 = inlined_call_operand.vmem [shape: f32[32,32], index: 8, kind: input, shape index: {}]   ;;  %s1312_s9 = inlined_call_operand.vmem [shape: f32[1,32], index: 9, kind: input, shape index: {}]   ;;  %s1313_s10 = inlined_call_operand.vmem [shape: f32[32,32], index: 10, kind: input, shape index: {}]   ;;  %s1314_s11 = inlined_call_operand.vmem [shape: f32[1,32], index: 11, kind: input, shape index: {}]   ;;  %s1315_s12 = inlined_call_operand.hbm [shape: f32[16,32], index: 12, kind: output, shape index: {0}]   ;;  %s1316_s13 = inlined_call_operand.vmem [shape: f32[2,32,32], index: 13, kind: output, shape index: {1}]  }
   0x1   :  { %v111_v0 = vld [vmem:[%s1309_s6 + $0x10] sm:$0xff]  ;;  %v112_v1 = vld [vmem:[%s1309_s6 + $0x18] sm:$0xff]  ;;  %819 = vmatprep.subr.bf16.mxu1 %v1003_v3  ;;  %811 = vmatprep.subr.bf16.mxu0 %v1003_v3  ;;  %v109_v6 = vld [vmem:[%s1309_s6] sm:$0xff] }
   0x2   :  { %v50_v2 = vld [vmem:[%s1307_s4 + $0x10] sm:$0xff]  ;;  %v114_v4 = vpack.c.bf16 %v112_v1, %v111_v0  ;;  %v51_v5 = vld [vmem:[%s1307_s4 + $0x18] sm:$0xff]  ;;  %v110_v7 = vld [vmem:[%s1309_s6 + $0x8] sm:$0xff]  ;;  %823 = vmatprep.mubr.msk.bf16.mxu1 %vm1004_vm0, %v1003_v3  ;;  %815 = vmatprep.mubr.msk.bf16.mxu0 %vm1004_vm0, %v1003_v3 }
   0x3   :  { %v53_v8 = vpack.c.bf16 %v51_v5, %v50_v2  ;;  %v48_v9 = vld [vmem:[%s1307_s4] sm:$0xff]  ;;  %v113_v10 = vpack.c.bf16 %v110_v7, %v109_v6  ;;  %v107_v12 = vld [vmem:[%s1304_s1 + $0x8] sm:$0xff] }
   0x4   :  { %820 = vmatpush3.bf16.msra.mxu1 %v114_v4  ;;  %v106_v11 = vld [vmem:[%s1304_s1] sm:$0xff]  ;;  %v49_v13 = vld [vmem:[%s1307_s4 + $0x8] sm:$0xff] }
   0x5   :  { %821 = vmatprep.subr.bf16.mxu1 %v1003_v3  ;;  %812 = vmatpush3.bf16.msra.mxu0 %v53_v8  ;;  %v52_v14 = vpack.c.bf16 %v49_v13, %v48_v9  ;;  %v45_v15 = vld [vmem:[%s1303_s0] sm:$0xff]  ;;  %v46_v16 = vld [vmem:[%s1303_s0 + $0x8] sm:$0xff] }
   0x6   :  { %19 = vsyncpa [#allocation3], 0  ;;  %813 = vmatprep.subr.bf16.mxu0 %v1003_v3  ;;  %v108_v17 = vpack.c.bf16 %v107_v12, %v106_v11  ;;  %vm61_vm1 = vcmask 261120   ;;  %v47_v18 = vpack.c.bf16 %v46_v16, %v45_v15  ;;  %v171_v19 = vld [vmem:[%s1311_s8 + $0x10] sm:$0xff]  ;;  %v172_v20 = vld [vmem:[%s1311_s8 + $0x18] sm:$0xff]  ;;  %vm298_vm2 = vcmask 64512  }
   0x7   :  { %v174_v21 = vpack.c.bf16 %v172_v20, %v171_v19  ;;  %v169_v22 = vld [vmem:[%s1311_s8] sm:$0xff]  ;;  %v170_v23 = vld [vmem:[%s1311_s8 + $0x8] sm:$0xff]  ;;  %s1008_s19 = smov 16   ;;  %s1009_s20 = smov 8   ;;  %vm681_vm3 = vcmask 130048   ;;  %vm684_vm4 = vcmask 195584  }
   0x8   :  { %822 = vmatpush3.bf16.msra.mxu1 %v113_v10  ;;  %v173_v24 = vpack.c.bf16 %v170_v23, %v169_v22  ;;  %v166_v26 = vld [vmem:[%s1305_s2] sm:$0xff]  ;;  %v167_v27 = vld [vmem:[%s1305_s2 + $0x8] sm:$0xff]  ;;  %s1005_s2 = smov 120   ;;  %s1010_s21 = smov 24  }
   0x9   :  { %814 = vmatpush3.bf16.msra.mxu0 %v52_v14  ;;  %v168_v29 = vpack.c.bf16 %v167_v27, %v166_v26  ;;  %v769_v30 = vld [vmem:[%s1310_s7] ss:$0 sm:$0xff]  ;;  %s1006_s7 = smov 112   ;;  %v432_v26 = vld [vmem:[%s1306_s3 + $0x18] sm:$0xff] }
   0xa   :  { %827 = vmatprep.subr.bf16.mxu0 %v1003_v3  ;;  %v767_v32 = vld [vmem:[%s1308_s5] ss:$0 sm:$0xff]  ;;  %s1007_s5 = smov 104  }
   0xb   :  { %824 = vmatmul.mubr.msk.bf16.vlgmr.msra.gmra.mxu1 %vm61_vm1, %v108_v17  ;;  %v431_v17 = vld [vmem:[%s1306_s3 + $0x10] sm:$0xff] }
   0xc   :  { %816 = vmatmul.mubr.msk.bf16.vlgmr.msra.gmra.mxu0 %vm61_vm1, %v47_v18 }
   0xd   :  { %831 = vmatprep.mubr.msk.bf16.mxu0 %vm1004_vm0, %v1003_v3  ;;  %828 = vmatpush3.bf16.msra.mxu0 %v174_v21  ;;  %v429_v21 = vld [vmem:[%s1306_s3] sm:$0xff] }
   0xe   :  { %829 = vmatprep.subr.bf16.mxu0 %v1003_v3 }
  0x11   :  { %830 = vmatpush3.bf16.msra.mxu0 %v173_v24 }
  0x14   :  { %832 = vmatmul.mubr.msk.bf16.vlgmr.msra.gmra.mxu0 %vm61_vm1, %v168_v29 }
  0xcb   :  { %v159_v25 = vpop.f32.mrf.mxu1 }
  0xcc   :  { %v99_v28 = vpop.f32.mrf.mxu0  ;;  %v160_v35 = vadd.f32 %v769_v30, %v159_v25 }
  0xcd   :  { %v825_v31 = vpop.f32.mrf.mxu1  ;;  %v100_v36 = vadd.f32 %v767_v32, %v99_v28 }
  0xce   :  { %v817_v33 = vpop.f32.mrf.mxu0 }
  0xcf   :  { %v162_v34 = vpop.f32.mrf.mxu1 }
  0xd0   :  { %v163_v37 = vadd.f32 %v769_v30, %v162_v34  ;;  %v102_v38 = vpop.f32.mrf.mxu0 }
  0xd1   :  { %v826_v39 = vpop.f32.mrf.mxu1  ;;  %v103_v40 = vadd.f32 %v767_v32, %v102_v38  ;;  %v430_v32 = vld [vmem:[%s1306_s3 + $0x8] sm:$0xff] }
  0xd2   :  { %v899_v41 = vpack.i.bf16 %v163_v37, %v160_v35  ;;  %v818_v42 = vpop.f32.mrf.mxu0  ;;  %v433_v39 = vld [vmem:[%s1306_s3 + $0x20] sm:$0xff] }
  0xd3   :  { %v904_v43 = vpack.i.bf16 %v103_v40, %v100_v36 }
  0xd4   :  { %900 = vrot.lane.b32.xlu1 %v899_v41, %s1005_s2  ;;  %890 = vrot.lane.b32.xlu0 %v899_v41, %s1006_s7  ;;  %v219_v11 = vpop.f32.mrf.mxu0 }
  0xd6   :  { %v833_v12 = vpop.f32.mrf.mxu0 }
  0xd8   :  { %895 = vrot.lane.b32.xlu0 %v899_v41, %s1007_s5  ;;  %905 = vrot.lane.b32.xlu1 %v904_v43, %s1005_s2  ;;  %v222_v13 = vpop.f32.mrf.mxu0 }
  0xda   :  { %v834_v14 = vpop.f32.mrf.mxu0 }
  0xdc   :  { %910 = vrot.lane.b32.xlu0 %v904_v43, %s1006_s7  ;;  %915 = vrot.lane.b32.xlu1 %v904_v43, %s1007_s5 }
 0x146   :  { %v901_v44 = vpop.permute.xlu1 %900  ;;  %v891_v45 = vpop.permute.xlu0 %890 }
 0x147   :  { %v893_v46 = vunpack.i.h.bf16 %v891_v45  ;;  %v892_v47 = vunpack.i.l.bf16 %v891_v45  ;;  %v903_v54 = vunpack.i.h.bf16 %v901_v44  ;;  %v902_v55 = vunpack.i.l.bf16 %v901_v44 }
 0x149   :  { %v272_v62 = vpack.c.bf16 %v903_v54, %v163_v37  ;;  %v270_v63 = vpack.c.bf16 %v902_v55, %v160_v35  ;;  %v435_v37 = vld [vmem:[%s1306_s3 + $0x30] sm:$0xff]  ;;  %v771_v55 = vld [vmem:[%s1312_s9] ss:$0 sm:$0xff] }
 0x14a   :  { %v896_v48 = vpop.permute.xlu0 %895  ;;  %v906_v49 = vpop.permute.xlu1 %905 }
 0x14b   :  { %v898_v50 = vunpack.i.h.bf16 %v896_v48  ;;  %v897_v51 = vunpack.i.l.bf16 %v896_v48  ;;  %v908_v52 = vunpack.i.h.bf16 %v906_v49  ;;  %v907_v53 = vunpack.i.l.bf16 %v906_v49 }
 0x14c   :  { %v306_v2 = vsel %vm298_vm2, %v270_v63, 0  ;;  %v367_v4 = vsel %vm298_vm2, %v272_v62, 0 }
 0x14d   :  { %v271_v56 = vpack.c.bf16 %v897_v51, %v892_v47  ;;  %v273_v57 = vpack.c.bf16 %v898_v50, %v893_v46  ;;  %v248_v58 = vpack.c.bf16 %v908_v52, %v103_v40  ;;  %v246_v59 = vpack.c.bf16 %v907_v53, %v100_v36  ;;  %v434_v46 = vld [vmem:[%s1306_s3 + $0x28] sm:$0xff]  ;;  %v436_v51 = vld [vmem:[%s1306_s3 + $0x38] sm:$0xff]  ;;  %s1011_s3 = smov [#allocation2]  }
 0x14e   :  { %v911_v0 = vpop.permute.xlu0 %910  ;;  %v916_v1 = vpop.permute.xlu1 %915  ;;  %s752_s9 = sshll.u32 %s1011_s3, 4  ;;  %s753_s9 = int_to_ptr.vmem [resolvable:$true] %s752_s9 }
 0x14f   :  { %875 = vmatprep.subr.msk.bf16.mxu1 %vm298_vm2, %v271_v56  ;;  %839 = vmatprep.mubr.msk.bf16.mxu1 %vm298_vm2, %v246_v59  ;;  %v309_v60 = vsel %vm298_vm2, %v271_v56, 0  ;;  %v370_v61 = vsel %vm298_vm2, %v273_v57, 0  ;;  %v913_v5 = vunpack.i.h.bf16 %v911_v0  ;;  %v912_v6 = vunpack.i.l.bf16 %v911_v0  ;;  %s981_s23 = scalar_lea.vmem %s753_s9, 256  ;;  %p986_p1 = scmp.lt.s32.totalorder %s753_s9, %s753_s9 }
 0x150   :  { %877 = vmatprep.subr.msk.bf16.mxu0 %vm298_vm2, %v273_v57  ;;  %847 = vmatprep.mubr.msk.bf16.mxu0 %vm298_vm2, %v248_v58  ;;  %v918_v7 = vunpack.i.h.bf16 %v916_v1  ;;  %v917_v8 = vunpack.i.l.bf16 %v916_v1  ;;  %v1211_v56 = vadd.f32 %v771_v55, %v219_v11  ;;  %v1213_v57 = vadd.f32 %v771_v55, %v222_v13  ;;  %p982_p0 = scmp.ne.s32.totalorder %s753_s9, %s981_s23  ;;  %p987_p2 = scmp.lt.s32.totalorder %s981_s23, %s981_s23 }
 0x151   :  { %836 = vmatpush3.bf16.xpose.msra.mxu1 %v309_v60  ;;  %844 = vmatpush3.bf16.xpose.msra.mxu0 %v370_v61 }
 0x152   :  { %876 = vmatprep.subr.msk.bf16.mxu1 %vm298_vm2, %v270_v63  ;;  %878 = vmatprep.subr.msk.bf16.mxu0 %vm298_vm2, %v272_v62  ;;  %v249_v9 = vpack.c.bf16 %v918_v7, %v913_v5  ;;  %v247_v10 = vpack.c.bf16 %v917_v8, %v912_v6  ;;  %v919_v58 = vpack.i.bf16 %v1213_v57, %v1211_v56  ;;  %p988_p3 = por %p987_p2, %p986_p1 }
 0x154   :  { %p989_p4 = pnand %p988_p3, %p982_p0 }
 0x159   :  { %838 = vmatpush3.bf16.xpose.msra.mxu1 %v306_v2  ;;  %846 = vmatpush3.bf16.xpose.msra.mxu0 %v367_v4 }
 0x160   :  { %840 = vmatmul.mubr.msk.bf16.vlgmr.msra.gmra.mxu1 %vm298_vm2, %v247_v10  ;;  %848 = vmatmul.mubr.msk.bf16.vlgmr.msra.gmra.mxu0 %vm298_vm2, %v249_v9 }
 0x220   :  { %v841_v15 = vpop.f32.mrf.mxu1  ;;  %v849_v16 = vpop.f32.mrf.mxu0 }
 0x221   :  { %v423_v18 = vmul.f32 0.35355338, %v841_v15  ;;  %v427_v30 = vmul.f32 0.35355338, %v849_v16 }
 0x222   :  { %v345_v19 = vpop.f32.mrf.mxu1  ;;  %v406_v20 = vpop.f32.mrf.mxu0 }
 0x223   :  { %v421_v22 = vmul.f32 0.35355338, %v345_v19  ;;  %v439_v23 = vadd.f32 %v431_v17, %v423_v18  ;;  %v425_v33 = vmul.f32 0.35355338, %v406_v20  ;;  %v443_v41 = vadd.f32 %v435_v37, %v427_v30 }
 0x224   :  { %v842_v24 = vpop.f32.mrf.mxu1  ;;  %v850_v25 = vpop.f32.mrf.mxu0 }
 0x225   :  { %v424_v27 = vmul.f32 0.35355338, %v842_v24  ;;  %v451_v28 = vsel %vm61_vm1, %v439_v23, -inf  ;;  %v437_v29 = vadd.f32 %v429_v21, %v421_v22  ;;  %v441_v45 = vadd.f32 %v433_v39, %v425_v33 }
 0x226   :  { %452 = vmax.xlane.f32.xlu1 %v451_v28  ;;  %v348_v31 = vpop.f32.mrf.mxu1  ;;  %v409_v38 = vpop.f32.mrf.mxu0  ;;  %v428_v47 = vmul.f32 0.35355338, %v850_v25  ;;  %v463_v48 = vsel %vm61_vm1, %v443_v41, -inf }
 0x227   :  { %v422_v34 = vmul.f32 0.35355338, %v348_v31  ;;  %v445_v35 = vsel %vm61_vm1, %v437_v29, -inf  ;;  %v440_v36 = vadd.f32 %v432_v26, %v424_v27  ;;  %v426_v42 = vmul.f32 0.35355338, %v409_v38 }
 0x228   :  { %446 = vmax.xlane.f32.xlu0 %v445_v35  ;;  %v457_v49 = vsel %vm61_vm1, %v441_v45, -inf  ;;  %v444_v53 = vadd.f32 %v436_v51, %v428_v47 }
 0x229   :  { %v438_v40 = vadd.f32 %v430_v32, %v422_v34  ;;  %v454_v43 = vsel %vm61_vm1, %v440_v36, -inf  ;;  %v442_v50 = vadd.f32 %v434_v46, %v426_v42 }
 0x22a   :  { %v466_v54 = vsel %vm61_vm1, %v444_v53, -inf }
 0x22b   :  { %v448_v44 = vsel %vm61_vm1, %v438_v40, -inf  ;;  %v460_v52 = vsel %vm61_vm1, %v442_v50, -inf }
 0x22c   :  { %455 = vmax.xlane.f32.xlu0 %v454_v43  ;;  %449 = vmax.xlane.f32.xlu1 %v448_v44 }
 0x230   :  { %464 = vmax.xlane.f32.xlu1 %v463_v48  ;;  %458 = vmax.xlane.f32.xlu0 %v457_v49 }
 0x234   :  { %461 = vmax.xlane.f32.xlu0 %v460_v52 }
 0x238   :  { %467 = vmax.xlane.f32.xlu0 %v466_v54 }
 0x241   :  { %920 = vrot.lane.b32.xlu1 %v919_v58, %s1006_s7 }
 0x2af   :  { %v453_v59 = vpop.xlane.xlu1 %452 }
 0x2b0   :  { %v471_v60 = vsub.f32 %v439_v23, %v453_v59 }
 0x2b1   :  { %v447_v61 = vpop.xlane.xlu0 %446 }
 0x2b2   :  { %v481_v62 = vmul.f32 1.442695, %v471_v60  ;;  %v469_v63 = vsub.f32 %v437_v29, %v447_v61 }
 0x2b4   :  { %949 = vpow2.f32 %v481_v62  ;;  %v477_v0 = vmul.f32 1.442695, %v469_v63 }
 0x2b5   :  { %v456_v1 = vpop.xlane.xlu0 %455  ;;  %v450_v2 = vpop.xlane.xlu1 %449 }
 0x2b6   :  { %951 = vpow2.f32 %v477_v0  ;;  %v472_v4 = vsub.f32 %v440_v36, %v456_v1  ;;  %v470_v5 = vsub.f32 %v438_v40, %v450_v2 }
 0x2b8   :  { %v483_v6 = vmul.f32 1.442695, %v472_v4  ;;  %v479_v7 = vmul.f32 1.442695, %v470_v5 }
 0x2b9   :  { %v465_v8 = vpop.xlane.xlu1 %464  ;;  %v459_v9 = vpop.xlane.xlu0 %458 }
 0x2ba   :  { %953 = vpow2.f32 %v483_v6  ;;  %v475_v10 = vsub.f32 %v443_v41, %v465_v8  ;;  %v473_v11 = vsub.f32 %v441_v45, %v459_v9 }
 0x2bb   :  { %955 = vpow2.f32 %v479_v7 }
 0x2bc   :  { %v489_v12 = vmul.f32 1.442695, %v475_v10  ;;  %v485_v13 = vmul.f32 1.442695, %v473_v11 }
 0x2bd   :  { %v462_v14 = vpop.xlane.xlu0 %461  ;;  %v921_v36 = vpop.permute.xlu1 %920 }
 0x2be   :  { %957 = vpow2.f32 %v489_v12  ;;  %v474_v15 = vsub.f32 %v442_v50, %v462_v14  ;;  %v923_v55 = vunpack.i.h.bf16 %v921_v36  ;;  %v690_v14 = vld [vmem:[%s1313_s10 + $0x10] sm:$0xff] }
 0x2bf   :  { %959 = vpow2.f32 %v485_v13 }
 0x2c0   :  { %v487_v21 = vmul.f32 1.442695, %v474_v15  ;;  %v691_v15 = vld [vmem:[%s1313_s10 + $0x18] sm:$0xff] }
 0x2c1   :  { %v950_v16 = vpop.eup %949  ;;  %v468_v17 = vpop.xlane.xlu0 %467 }
 0x2c2   :  { %v476_v18 = vsub.f32 %v444_v53, %v468_v17  ;;  %v499_v19 = vsel %vm61_vm1, %v950_v16, 0.0  ;;  %v693_v17 = vpack.c.bf16 %v691_v15, %v690_v14 }
 0x2c3   :  { %v952_v20 = vpop.eup %951  ;;  %500 = vadd.xlane.f32.xlu1 %v499_v19 }
 0x2c4   :  { %v491_v22 = vmul.f32 1.442695, %v476_v18  ;;  %v493_v23 = vsel %vm61_vm1, %v952_v20, 0.0 }
 0x2c6   :  { %961 = vpow2.f32 %v491_v22 }
 0x2c7   :  { %v954_v24 = vpop.eup %953  ;;  %494 = vadd.xlane.f32.xlu1 %v493_v23  ;;  %963 = vpow2.f32 %v487_v21  ;;  %v689_v21 = vld [vmem:[%s1313_s10 + $0x8] sm:$0xff] }
 0x2c8   :  { %v502_v25 = vsel %vm61_vm1, %v954_v24, 0.0  ;;  %v956_v26 = vpop.eup %955 }
 0x2c9   :  { %503 = vadd.xlane.f32.xlu0 %v502_v25  ;;  %v496_v29 = vsel %vm61_vm1, %v956_v26, 0.0 }
 0x2cb   :  { %v958_v27 = vpop.eup %957 }
 0x2cc   :  { %v511_v28 = vsel %vm61_vm1, %v958_v27, 0.0  ;;  %v960_v30 = vpop.eup %959 }
 0x2cd   :  { %512 = vadd.xlane.f32.xlu1 %v511_v28  ;;  %497 = vadd.xlane.f32.xlu0 %v496_v29  ;;  %v505_v31 = vsel %vm61_vm1, %v960_v30, 0.0 }
 0x2d1   :  { %506 = vadd.xlane.f32.xlu1 %v505_v31 }
 0x2d3   :  { %v1224_v32 = vpop.eup %961 }
 0x2d4   :  { %v514_v33 = vsel %vm61_vm1, %v1224_v32, 0.0  ;;  %v1228_v34 = vpop.eup %963 }
 0x2d5   :  { %515 = vadd.xlane.f32.xlu0 %v514_v33  ;;  %v508_v35 = vsel %vm61_vm1, %v1228_v34, 0.0 }
 0x2d9   :  { %509 = vadd.xlane.f32.xlu0 %v508_v35 }
 0x2e2   :  { %930 = vrot.lane.b32.xlu1 %v919_v58, %s1005_s2 }
 0x2ef   :  { %925 = vrot.lane.b32.xlu0 %v919_v58, %s1007_s5  ;;  %v922_v58 = vunpack.i.l.bf16 %v921_v36 }
 0x34c   :  { %v501_v37 = vpop.xlane.xlu1 %500 }
 0x34d   :  { %965 = vrcp.f32 %v501_v37 }
 0x350   :  { %v495_v38 = vpop.xlane.xlu1 %494 }
 0x351   :  { %967 = vrcp.f32 %v495_v38 }
 0x352   :  { %v504_v39 = vpop.xlane.xlu0 %503 }
 0x353   :  { %969 = vrcp.f32 %v504_v39 }
 0x356   :  { %v513_v40 = vpop.xlane.xlu1 %512  ;;  %v498_v41 = vpop.xlane.xlu0 %497 }
 0x357   :  { %971 = vrcp.f32 %v513_v40 }
 0x358   :  { %973 = vrcp.f32 %v498_v41 }
 0x35a   :  { %v966_v42 = vpop.eup %965  ;;  %v507_v43 = vpop.xlane.xlu1 %506 }
 0x35b   :  { %975 = vrcp.f32 %v507_v43  ;;  %v527_v44 = vmul.f32 %v966_v42, %v950_v16 }
 0x35d   :  { %535 = vst.msk [vmem:[%s1316_s13 + $0x10] sm:$0xff] %vm61_vm1, %v527_v44 }
 0x35e   :  { %v968_v45 = vpop.eup %967  ;;  %v516_v46 = vpop.xlane.xlu0 %515 }
 0x35f   :  { %977 = vrcp.f32 %v516_v46  ;;  %v525_v47 = vmul.f32 %v968_v45, %v952_v20  ;;  %v931_v52 = vpop.permute.xlu1 %930  ;;  %v688_v20 = vld [vmem:[%s1313_s10] sm:$0xff] }
 0x360   :  { %v970_v48 = vpop.eup %969  ;;  %v933_v61 = vunpack.i.h.bf16 %v931_v52  ;;  %v932_v62 = vunpack.i.l.bf16 %v931_v52  ;;  %v692_v23 = vpack.c.bf16 %v689_v21, %v688_v20  ;;  %v781_v46 = vld [vmem:[%s1314_s11] ss:$0 sm:$0xff] }
 0x361   :  { %533 = vst.msk [vmem:[%s1316_s13] sm:$0xff] %vm61_vm1, %v525_v47  ;;  %v528_v49 = vmul.f32 %v970_v48, %v954_v24 }
 0x362   :  { %v510_v50 = vpop.xlane.xlu0 %509  ;;  %v296_v7 = vpack.c.bf16 %v933_v61, %v1213_v57  ;;  %v294_v8 = vpack.c.bf16 %v932_v62, %v1211_v56 }
 0x363   :  { %979 = vrcp.f32 %v510_v50  ;;  %536 = vst.msk [vmem:[%s1316_s13 + $0x18] sm:$0xff] %vm61_vm1, %v528_v49  ;;  %v542_v57 = vpack.c.bf16 %v528_v49, %v527_v44 }
 0x364   :  { %v972_v51 = vpop.eup %971 }
 0x365   :  { %v974_v53 = vpop.eup %973  ;;  %v531_v54 = vmul.f32 %v972_v51, %v958_v27 }
 0x366   :  { %v926_v59 = vpop.permute.xlu0 %925  ;;  %v526_v60 = vmul.f32 %v974_v53, %v956_v26 }
 0x367   :  { %v928_v63 = vunpack.i.h.bf16 %v926_v59  ;;  %v927_v0 = vunpack.i.l.bf16 %v926_v59  ;;  %539 = vst.msk [vmem:[%s1316_s13 + $0x30] sm:$0xff] %vm61_vm1, %v531_v54 }
 0x368   :  { %v976_v1 = vpop.eup %975  ;;  %534 = vst.msk [vmem:[%s1316_s13 + $0x8] sm:$0xff] %vm61_vm1, %v526_v60  ;;  %v541_v2 = vpack.c.bf16 %v526_v60, %v525_v47 }
 0x369   :  { %v297_v4 = vpack.c.bf16 %v928_v63, %v923_v55  ;;  %v295_v5 = vpack.c.bf16 %v927_v0, %v922_v58  ;;  %v529_v6 = vmul.f32 %v976_v1, %v960_v30 }
 0x36a   :  { %855 = vmatprep.mubr.msk.bf16.mxu1 %vm61_vm1, %v541_v2 }
 0x36b   :  { %851 = vmatprep.subr.bf16.mxu1 %v295_v5  ;;  %859 = vmatprep.subr.bf16.mxu0 %v297_v4  ;;  %537 = vst.msk [vmem:[%s1316_s13 + $0x20] sm:$0xff] %vm61_vm1, %v529_v6 }
 0x36c   :  { %v978_v9 = vpop.eup %977  ;;  %852 = vmatpush3.bf16.msra.mxu1 %v295_v5  ;;  %860 = vmatpush3.bf16.msra.mxu0 %v297_v4 }
 0x36d   :  { %853 = vmatprep.subr.bf16.mxu1 %v294_v8  ;;  %861 = vmatprep.subr.bf16.mxu0 %v296_v7  ;;  %v532_v10 = vmul.f32 %v978_v9, %v1224_v32 }
 0x36f   :  { %540 = vst.msk [vmem:[%s1316_s13 + $0x38] sm:$0xff] %vm61_vm1, %v532_v10  ;;  %v544_v13 = vpack.c.bf16 %v532_v10, %v531_v54 }
 0x370   :  { %v980_v56 = vpop.eup %979  ;;  %854 = vmatpush3.bf16.msra.mxu1 %v294_v8  ;;  %862 = vmatpush3.bf16.msra.mxu0 %v296_v7 }
 0x371   :  { %v530_v11 = vmul.f32 %v980_v56, %v1228_v34  ;;  %867 = vmatprep.subr.bf16.mxu1 %v1003_v3 }
 0x373   :  { %856 = vmatmul.mubr.msk.bf16.vlgmr.msra.gmra.mxu1 %vm61_vm1, %v542_v57  ;;  %538 = vst.msk [vmem:[%s1316_s13 + $0x28] sm:$0xff] %vm61_vm1, %v530_v11  ;;  %v543_v12 = vpack.c.bf16 %v530_v11, %v529_v6 }
 0x374   :  { %871 = vmatprep.mubr.msk.bf16.mxu1 %vm1004_vm0, %v1003_v3  ;;  %868 = vmatpush3.bf16.msra.mxu1 %v693_v17 }
 0x375   :  { %863 = vmatprep.mubr.msk.bf16.mxu0 %vm61_vm1, %v543_v12  ;;  %869 = vmatprep.subr.bf16.mxu1 %v1003_v3 }
 0x376   :  { %864 = vmatmul.mubr.msk.bf16.vlgmr.msra.gmra.mxu0 %vm61_vm1, %v544_v13 }
 0x378   :  { %870 = vmatpush3.bf16.msra.mxu1 %v692_v23 }
 0x433   :  { %v857_v16 = vpop.f32.mrf.mxu1 }
 0x435   :  { %v585_v18 = vpop.f32.mrf.mxu1 }
 0x436   :  { %v865_v19 = vpop.f32.mrf.mxu0 }
 0x437   :  { %v939_v22 = vpack.i.bf16 %v865_v19, %v857_v16  ;;  %v858_v24 = vpop.f32.mrf.mxu1 }
 0x438   :  { %v640_v25 = vpop.f32.mrf.mxu0 }
 0x439   :  { %940 = vrot.lane.b32.xlu0 %v939_v22, %s1008_s19  ;;  %v588_v27 = vpop.f32.mrf.mxu1 }
 0x43a   :  { %v866_v26 = vpop.f32.mrf.mxu0 }
 0x43b   :  { %v944_v3 = vpack.i.bf16 %v866_v26, %v858_v24 }
 0x43c   :  { %v643_v28 = vpop.f32.mrf.mxu0 }
 0x43d   :  { %v934_v29 = vpack.i.bf16 %v643_v28, %v588_v27 }
 0x43f   :  { %935 = vrot.lane.b32.xlu1 %v934_v29, %s1009_s20 }
 0x443   :  { %945 = vrot.lane.b32.xlu1 %v944_v3, %s1010_s21 }
 0x4ab   :  { %v941_v31 = vpop.permute.xlu0 %940 }
 0x4ac   :  { %v943_v36 = vunpack.i.h.bf16 %v941_v31  ;;  %v942_v37 = vunpack.i.l.bf16 %v941_v31 }
 0x4b1   :  { %v936_v30 = vpop.permute.xlu1 %935 }
 0x4b2   :  { %v938_v32 = vunpack.i.h.bf16 %v936_v30  ;;  %v937_v33 = vunpack.i.l.bf16 %v936_v30 }
 0x4b4   :  { %v680_v34 = vsel %vm298_vm2, %v640_v25, %v938_v32  ;;  %v679_v35 = vsel %vm298_vm2, %v585_v18, %v937_v33 }
 0x4b5   :  { %v946_v38 = vpop.permute.xlu1 %945  ;;  %v682_v41 = vsel %vm681_vm3, %v679_v35, %v942_v37  ;;  %v683_v42 = vsel %vm681_vm3, %v680_v34, %v943_v36 }
 0x4b6   :  { %v948_v39 = vunpack.i.h.bf16 %v946_v38  ;;  %v947_v40 = vunpack.i.l.bf16 %v946_v38 }
 0x4b8   :  { %v685_v43 = vsel %vm684_vm4, %v682_v41, %v947_v40  ;;  %v686_v44 = vsel %vm684_vm4, %v683_v42, %v948_v39 }
 0x4b9   :  { %v687_v45 = vpack.c.bf16 %v686_v44, %v685_v43 }
 0x4bb   :  { %872 = vmatmul.mubr.msk.bf16.vlgmr.msra.gmra.mxu1 %vm61_vm1, %v687_v45 }
 0x57b   :  { %v738_v47 = vpop.f32.mrf.mxu1 }
 0x57c   :  { %v739_v48 = vadd.f32 %v781_v46, %v738_v47 }
 0x57d   :  { %v873_v49 = vpop.f32.mrf.mxu1 }
 0x57e   :  { %745 = vst.msk [vmem:[#allocation2] sm:$0xff] %vm61_vm1, %v739_v48 }
 0x57f   :  { %v741_v50 = vpop.f32.mrf.mxu1 }
 0x580   :  { %v742_v51 = vadd.f32 %v781_v46, %v741_v50 }
 0x581   :  { %v874_v52 = vpop.f32.mrf.mxu1 }
 0x582   :  { %746 = vst.msk [vmem:[#allocation2 + $0x8] sm:$0xff] %vm61_vm1, %v742_v51 }
 0x583   :  { %992 = shalt.err (!%p989_p4)
}
 0x584   :  { %s1012_s11 = smov 128  }
 0x585   :  { %758 = dma.vmem_to_hbm [thread:$0]  %s753_s9, 256, %s1315_s12, [#allocation3], %s1012_s11, %s1012_s11, %s1009_s20  }
 0x586   :  { %1001 = dma.done.wait [#allocation3], 256  }
 0x587   :  { %1002 = vsyncadd [#allocation3], 4294967040 }
 0x588   :  { %766 = vsyncpa [#allocation3], 1 }

</bundles_post_ra>
